<compile_context>
chip_gen: v5e
topology: v5e:2x2
jax: 0.10.0
libtpu: 0.0.40
codegen_flags: <defaults>
</compile_context>

<pallas_src>
import jax
import jax.numpy as jnp
from jax.experimental import pallas as pl
from jax.experimental.pallas import tpu as pltpu


def _bert_output_kernel(eps, compute_dtype):
    def kernel(hs_ref, w_ref, x_ref, params_ref, o_ref):
        # dense: (tm, I) @ (I, H) on the MXU, bf16 inputs, f32 accumulation.
        hs = hs_ref[...].astype(compute_dtype)
        h = jnp.dot(hs, w_ref[...], preferred_element_type=jnp.float32)

        p = params_ref[...].astype(jnp.float32)   # (3, H): bias, gamma, beta
        bias = p[0:1, :]
        gamma = p[1:2, :]
        beta = p[2:3, :]

        # dropout: eval/inference mode -> identity.
        # residual add in full f32 precision (x never touches the MXU).
        z = x_ref[...].astype(jnp.float32) + h + bias

        # LayerNorm over the hidden axis: var = E[z^2] - mean^2 (one hot pass).
        inv_h = 1.0 / z.shape[-1]
        mean = jnp.sum(z, axis=-1, keepdims=True) * inv_h
        mean_sq = jnp.sum(z * z, axis=-1, keepdims=True) * inv_h
        var = jnp.maximum(mean_sq - mean * mean, 0.0)
        out = (z - mean) * jax.lax.rsqrt(var + eps) * gamma + beta
        o_ref[...] = out.astype(o_ref.dtype)
    return kernel


def _vmem_capacity_bytes():
    try:
        return int(pltpu.get_tpu_info().vmem_capacity_bytes)
    except Exception:
        return 64 << 20  # conservative: v7x per-TensorCore VMEM


def _pick_tm(M, fits):
    """Largest MXU-friendly (multiple-of-16) row tile that fits VMEM.

    Prefers an even number of row tiles (megacore balance on v7x) and exact
    divisors of M (no padded compute).
    """
    cands = [t for t in (512, 256, 128, 64, 32, 16) if fits(t)]
    if not cands:
        cands = [16]
    # exact divisor with an even tile count >= 2
    for t in cands:
        if M % t == 0 and (M // t) % 2 == 0 and M // t >= 2:
            return t
    # exact divisor
    for t in cands:
        if M % t == 0:
            return t
    # padded, even tile count
    for t in cands:
        if pl.cdiv(M, t) % 2 == 0:
            return t
    return cands[0]


def bert_output(x, hidden_states, w, b, gamma, beta, *, eps=1e-12, tm=None,
                compute_dtype=jnp.bfloat16, out_dtype=None):
    """x: (B, S, H) residual input; hidden_states: (B, S, I) intermediate acts.

    Returns LayerNorm(x + hidden_states @ w + b) of shape (B, S, H).
    """
    B, S, H = x.shape
    I = hidden_states.shape[-1]
    M = B * S
    if out_dtype is None:
        out_dtype = x.dtype

    # Token-major 2D views; activations stay in their original dtype (the
    # matmul-side cast happens inside the kernel, no extra HBM pass).
    hs2 = hidden_states.reshape(M, I)
    x2 = x.reshape(M, H)
    w_c = w.astype(compute_dtype)                       # one-time parameter cast
    params = jnp.stack(
        [b.astype(jnp.float32), gamma.astype(jnp.float32),
         beta.astype(jnp.float32)], axis=0)             # (3, H) resident

    hs_bytes = jnp.dtype(hs2.dtype).itemsize
    x_bytes = jnp.dtype(x2.dtype).itemsize
    w_bytes = jnp.dtype(compute_dtype).itemsize
    out_bytes = jnp.dtype(out_dtype).itemsize

    cap = _vmem_capacity_bytes()
    budget = max(cap - (12 << 20), 16 << 20)
    resident = I * H * w_bytes + 3 * H * 4

    def _streamed(t):
        return 2 * t * I * hs_bytes + 2 * t * H * x_bytes + 2 * t * H * out_bytes

    def _fits(t):
        return resident + _streamed(t) <= budget

    if tm is None:
        tm = _pick_tm(M, _fits)
    # TODO(synk): if the bf16 weight alone exceeds the VMEM budget (huge I*H),
    # switch to a K-tiled streamed weight (grid over I, f32 accumulator scratch,
    # LN epilogue under pl.when on the last k step) instead of a resident weight.

    # Pad the token axis if it is not a multiple of the tile (padded rows are
    # computed on zeros and sliced off afterwards).
    Mp = pl.cdiv(M, tm) * tm
    if Mp != M:
        pad = Mp - M
        hs2 = jnp.pad(hs2, ((0, pad), (0, 0)))
        x2 = jnp.pad(x2, ((0, pad), (0, 0)))

    vmem_bytes = int(1.25 * (resident + _streamed(tm))) + (4 << 20)
    vmem_bytes = min(vmem_bytes, cap - (8 << 20))

    cost = pl.CostEstimate(
        flops=2 * M * I * H,
        transcendentals=M,  # one rsqrt per token row
        bytes_accessed=(M * I * hs_bytes + I * H * w_bytes + M * H * x_bytes
                        + M * H * out_bytes + 3 * H * 4),
    )

    # Constant-index operands: single-buffer (no second VMEM copy of the weight).
    def _const_spec(shape):
        return pl.BlockSpec(shape, lambda i: (0, 0),
                            pipeline_mode=pl.Buffered(1))

    out2 = pl.pallas_call(
        _bert_output_kernel(eps, compute_dtype),
        out_shape=jax.ShapeDtypeStruct((Mp, H), out_dtype),
        grid_spec=pltpu.PrefetchScalarGridSpec(
            num_scalar_prefetch=0,
            grid=(Mp // tm,),
            in_specs=[
                pl.BlockSpec((tm, I), lambda i: (i, 0)),   # hidden_states tile (streamed)
                _const_spec((I, H)),                       # dense weight (resident, bf16)
                pl.BlockSpec((tm, H), lambda i: (i, 0)),   # residual x tile (streamed)
                _const_spec((3, H)),                       # packed bias/gamma/beta
            ],
            out_specs=pl.BlockSpec((tm, H), lambda i: (i, 0)),
        ),
        compiler_params=pltpu.CompilerParams(
            dimension_semantics=("parallel",),
            vmem_limit_bytes=vmem_bytes),
        cost_estimate=cost,
    )(hs2, w_c, x2, params)

    return out2[:M].reshape(B, S, H)


if __name__ == "__main__":
    # Small but lane-aligned config: batch=2, seq=128, hidden=128, intermediate=512
    # TODO(synk): H=128 only half-fills the 256-wide v6e/v7x MXU; real BERT dims
    # (H=768/1024) fill it and need no change.
    B, S, H, I = 2, 128, 128, 512
    eps = 1e-12

    key = jax.random.PRNGKey(0)
    k_x, k_hs, k_w, k_b, k_g, k_be = jax.random.split(key, 6)

    x = jax.random.normal(k_x, (B, S, H), dtype=jnp.float32)
    hidden_states = jax.random.normal(k_hs, (B, S, I), dtype=jnp.float32)

    # Deterministic parameter init (shapes from nn.Linear(I, H), nn.LayerNorm(H))
    w = jax.random.normal(k_w, (I, H), dtype=jnp.float32) * (1.0 / jnp.sqrt(I))
    b = jax.random.normal(k_b, (H,), dtype=jnp.float32) * 0.02
    gamma = jnp.ones((H,), dtype=jnp.float32) + 0.01 * jax.random.normal(k_g, (H,))
    beta = 0.01 * jax.random.normal(k_be, (H,), dtype=jnp.float32)

    out = bert_output(x, hidden_states, w, b, gamma, beta, eps=eps)
    out = jax.block_until_ready(out)

    # Pure-JAX reference, matching the kernel's bf16-matmul / f32-everything-else math.
    h_ref = jnp.dot(hidden_states.astype(jnp.bfloat16), w.astype(jnp.bfloat16),
                    preferred_element_type=jnp.float32) + b
    z_ref = x + h_ref
    mu = z_ref.mean(-1, keepdims=True)
    var = ((z_ref - mu) ** 2).mean(-1, keepdims=True)
    ref = (z_ref - mu) * jax.lax.rsqrt(var + eps) * gamma + beta

    assert out.shape == (B, S, H)
    assert out.dtype == x.dtype
    assert jnp.allclose(out, ref.astype(out.dtype), atol=1e-2, rtol=1e-2), \
        "mismatch vs reference"

    print("KERNEL_OK")
</pallas_src>

<mosaic_0001>
module attributes {stable_mosaic.version = 11 : i64} {
  func.func @kernel(%arg0: i32, %arg1: memref<128x512xf32, #tpu.memory_space<vmem>>, %arg2: memref<512x128xbf16, #tpu.memory_space<vmem>>, %arg3: memref<128x128xf32, #tpu.memory_space<vmem>>, %arg4: memref<3x128xf32, #tpu.memory_space<vmem>>, %arg5: memref<128x128xf32, #tpu.memory_space<vmem>>) attributes {dimension_semantics = [#tpu.dimension_semantics<parallel>], iteration_bounds = array<i64: 2>, scalar_prefetch = 0 : i64, scratch_operands = 0 : i64, tpu.core_type = #tpu.core_type<tc>, window_params = [{transform_indices = @transform_0, window_bounds = array<i64: 128, 512>}, {pipeline_mode = #tpu.pipeline_mode<synchronous>, transform_indices = @transform_1, window_bounds = array<i64: 512, 128>}, {transform_indices = @transform_2, window_bounds = array<i64: 128, 128>}, {pipeline_mode = #tpu.pipeline_mode<synchronous>, transform_indices = @transform_3, window_bounds = array<i64: 3, 128>}, {transform_indices = @transform_4, window_bounds = array<i64: 128, 128>}]} {
    %c0 = arith.constant 0 : index
    %c0_0 = arith.constant 0 : index
    %0 = vector.load %arg1[%c0, %c0_0] : memref<128x512xf32, #tpu.memory_space<vmem>>, vector<128x512xf32>
    %1 = arith.truncf %0 : vector<128x512xf32> to vector<128x512xbf16>
    %c0_1 = arith.constant 0 : index
    %c0_2 = arith.constant 0 : index
    %2 = vector.load %arg2[%c0_1, %c0_2] : memref<512x128xbf16, #tpu.memory_space<vmem>>, vector<512x128xbf16>
    %cst = arith.constant dense<0.000000e+00> : vector<128x128xf32>
    %3 = tpu.matmul %1, %2, %cst {dimension_numbers = #tpu.dot_dimension_numbers<[1], [0], [0], [1], [0, 0, 1, 1], [], []>} : vector<128x512xbf16>, vector<512x128xbf16>, vector<128x128xf32> -> vector<128x128xf32>
    %c0_3 = arith.constant 0 : index
    %c0_4 = arith.constant 0 : index
    %4 = vector.load %arg4[%c0_3, %c0_4] : memref<3x128xf32, #tpu.memory_space<vmem>>, vector<3x128xf32>
    %5 = vector.extract_strided_slice %4 {offsets = [0, 0], sizes = [1, 128], strides = [1, 1]} : vector<3x128xf32> to vector<1x128xf32>
    %6 = vector.extract_strided_slice %4 {offsets = [1, 0], sizes = [1, 128], strides = [1, 1]} : vector<3x128xf32> to vector<1x128xf32>
    %7 = vector.extract_strided_slice %4 {offsets = [2, 0], sizes = [1, 128], strides = [1, 1]} : vector<3x128xf32> to vector<1x128xf32>
    %c0_5 = arith.constant 0 : index
    %c0_6 = arith.constant 0 : index
    %8 = vector.load %arg3[%c0_5, %c0_6] : memref<128x128xf32, #tpu.memory_space<vmem>>, vector<128x128xf32>
    %9 = arith.addf %8, %3 : vector<128x128xf32>
    %10 = vector.broadcast %5 : vector<1x128xf32> to vector<128x128xf32>
    %11 = arith.addf %9, %10 : vector<128x128xf32>
    %cst_7 = arith.constant dense<0.000000e+00> : vector<128xf32>
    %12 = vector.multi_reduction <add>, %11, %cst_7 [1] : vector<128x128xf32> to vector<128xf32>
    %13 = vector.shape_cast %12 : vector<128xf32> to vector<128x1xf32>
    %cst_8 = arith.constant 7.812500e-03 : f32
    %14 = vector.broadcast %cst_8 : f32 to vector<128x1xf32>
    %15 = arith.mulf %13, %14 : vector<128x1xf32>
    %16 = arith.mulf %11, %11 : vector<128x128xf32>
    %cst_9 = arith.constant dense<0.000000e+00> : vector<128xf32>
    %17 = vector.multi_reduction <add>, %16, %cst_9 [1] : vector<128x128xf32> to vector<128xf32>
    %18 = vector.shape_cast %17 : vector<128xf32> to vector<128x1xf32>
    %cst_10 = arith.constant 7.812500e-03 : f32
    %19 = vector.broadcast %cst_10 : f32 to vector<128x1xf32>
    %20 = arith.mulf %18, %19 : vector<128x1xf32>
    %21 = arith.mulf %15, %15 : vector<128x1xf32>
    %22 = arith.subf %20, %21 : vector<128x1xf32>
    %cst_11 = arith.constant 0.000000e+00 : f32
    %23 = vector.broadcast %cst_11 : f32 to vector<128x1xf32>
    %24 = arith.maximumf %22, %23 : vector<128x1xf32>
    %25 = vector.broadcast %15 : vector<128x1xf32> to vector<128x128xf32>
    %26 = arith.subf %11, %25 : vector<128x128xf32>
    %cst_12 = arith.constant 9.99999996E-13 : f32
    %27 = vector.broadcast %cst_12 : f32 to vector<128x1xf32>
    %28 = arith.addf %24, %27 : vector<128x1xf32>
    %29 = math.rsqrt %28 : vector<128x1xf32>
    %30 = vector.broadcast %29 : vector<128x1xf32> to vector<128x128xf32>
    %31 = arith.mulf %26, %30 : vector<128x128xf32>
    %32 = vector.broadcast %6 : vector<1x128xf32> to vector<128x128xf32>
    %33 = arith.mulf %31, %32 : vector<128x128xf32>
    %34 = vector.broadcast %7 : vector<1x128xf32> to vector<128x128xf32>
    %35 = arith.addf %33, %34 : vector<128x128xf32>
    %c0_13 = arith.constant 0 : index
    %c0_14 = arith.constant 0 : index
    %36 = vector.load %arg5[%c0_13, %c0_14] : memref<128x128xf32, #tpu.memory_space<vmem>>, vector<128x128xf32>
    tpu.vector_store %arg5[%c0_13, %c0_14], %35 {strides = array<i32>} : memref<128x128xf32, #tpu.memory_space<vmem>>, vector<128x128xf32>,
    return
  }
  func.func @transform_0(%arg0: i32) -> (i32, i32) {
    %c0_i32 = arith.constant 0 : i32
    %c0_i32_0 = arith.constant 0 : i32
    return %arg0, %c0_i32 : i32, i32
  }
  func.func @transform_1(%arg0: i32) -> (i32, i32) {
    %c0_i32 = arith.constant 0 : i32
    %c0_i32_0 = arith.constant 0 : i32
    %c0_i32_1 = arith.constant 0 : i32
    return %c0_i32, %c0_i32_0 : i32, i32
  }
  func.func @transform_2(%arg0: i32) -> (i32, i32) {
    %c0_i32 = arith.constant 0 : i32
    %c0_i32_0 = arith.constant 0 : i32
    return %arg0, %c0_i32 : i32, i32
  }
  func.func @transform_3(%arg0: i32) -> (i32, i32) {
    %c0_i32 = arith.constant 0 : i32
    %c0_i32_0 = arith.constant 0 : i32
    %c0_i32_1 = arith.constant 0 : i32
    return %c0_i32, %c0_i32_0 : i32, i32
  }
  func.func @transform_4(%arg0: i32) -> (i32, i32) {
    %c0_i32 = arith.constant 0 : i32
    %c0_i32_0 = arith.constant 0 : i32
    return %arg0, %c0_i32 : i32, i32
  }
}

</mosaic_0001>

<bundles_post_ra>
// kernel: tpu_custom_call.1
= control target key start
LH: loop header
LB: loop body
LE: loop exit
PB: predicated region body
PF: predicated region fallthrough
CT: control target
= control target key end

     0   :  { %s2479_s0 = inlined_call_operand.hbm [shape: f32[256,512], index: 0, kind: input, shape index: {}]   ;;  %s2480_s1 = inlined_call_operand.hbm [shape: bf16[512,128], index: 1, kind: input, shape index: {}]   ;;  %s2481_s2 = inlined_call_operand.hbm [shape: f32[256,128], index: 2, kind: input, shape index: {}]   ;;  %s2482_s3 = inlined_call_operand.hbm [shape: f32[3,128], index: 3, kind: input, shape index: {}]   ;;  %s2483_s4 = inlined_call_operand.hbm [shape: f32[256,128], index: 4, kind: output, shape index: {}]  }
   0x1   :  { %2488 = sst [smem:[#allocation18_spill]] %s2479_s0 }
   0x2   :  { %2489 = sst [smem:[#allocation19_spill]] %s2480_s1 }
   0x3   :  { %9 = vsyncpa [#allocation3], 0 }
   0x4   :  { %11 = vsyncpa [#allocation3 + $0x1], 0 }
   0x5   :  { %12 = vsyncpa [#allocation6], 0 }
   0x6   :  { %13 = vsyncpa [#allocation4], 0 }
   0x7   :  { %15 = vsyncpa [#allocation4 + $0x1], 0  ;;  %s1970_s15 = smov 0   ;;  %s1972_s16 = smov 0  }
   0x8   :  { %s1974_s17 = smov 0   ;;  %s1976_s18 = smov 0  }
   0x9 LB: > { %2490 = sst [smem:[#allocation15_spill]] %s1929_s17  ;;  %s1991_s19 = sadd.s32 4294967295, %s1933_s18   ;;  %s1933_s18 = sphi %s1976_s18, %s2506_s18   ;;  %s1929_s17 = sphi %s1974_s17, %s2508_s17   ;;  %s1925_s16 = sphi %s1972_s16, %s2510_s16   ;;  %s1921_s15 = sphi %s1970_s15, %s2509_s15  }
   0xa   : > { %s1436_s20 = sadd.s32 4294967294, %s1933_s18   ;;  %p41_p0 = scmp.ne.s32.totalorder %s1925_s16, %s1921_s15 }
   0xb   : > { %p2484_p1 = scmp.eq.s32.totalorder %s1991_s19, 0  ;;  %p133_p2 = scmp.eq.s32.totalorder %s1991_s19, 1 }
   0xc   : > { %p139_p3 = scmp.eq.s32.totalorder %s1436_s20, 1  ;;  %p1437_p5 = scmp.ge.s32.totalorder %s1933_s18, 1 }
   0xd   : > { %p2000_p4 = por %p2484_p1, %p41_p0  ;;  %p146_p7 = scmp.lt.s32.totalorder %s1933_s18, 3 }
   0xe   : > { %p2005_p6 = por %p139_p3, %p41_p0  ;;  %s2493_s1 = sld [smem:[#allocation19_spill]] }
   0xf   : > { %p2013_p8 = pnand %p1437_p5, %p146_p7  ;;  %s1935_s27 = smov [#allocation5]  }
  0x10   : > { %s159_s28 = sshll.u32 %s1935_s27, 4  ;;  %s2027_s30 = sadd.s32 1, %s1933_s18   ;;  %s160_s28 = int_to_ptr.vmem [resolvable:$true] %s159_s28 }
  0x11   : > { %p1637_p9 = pneg %p2013_p8  ;;  %2496 = sst [smem:[#allocation16_spill]] %s2027_s30 }
  0x12   : > { %s1936_s5 = smov 64   ;;  %s1937_s6 = smov 4  }
  0x13   : > { %p2021_p10 = pnand %p1637_p9, %p2484_p1  ;;  %s25_s7 = ssub.s32 %s1933_s18, %s2027_s30 }
  0x14   : > { %s157_s25 = sshll.u32 %s2493_s1, 4  ;;  %s28_s8 = sadd.s32 1, %s1929_s17  ;;  %s158_s25 = int_to_ptr.hbm [resolvable:$true] %s157_s25 }
  0x15   : > { %1640 = dma.hbm_to_vmem [thread:$0]  (!%p2021_p10), %s158_s25, 4096, %s160_s28, [#allocation6], %s1936_s5, %s1936_s5, %s1937_s6  }
  0x16   : > { %p26_p12 = scmp.eq.s32.totalorder %s25_s7, 0  ;;  %p35_p13 = scmp.ne.s32.totalorder %s1929_s17, %s1925_s16 }
  0x17   : > { %p36_p0 = scmp.eq.s32.totalorder %s1933_s18, 0  ;;  %p1657_p3 = scmp.lt.s32.totalorder %s1933_s18, 2 }
  0x18   : > { %s2039_s9 = scalar_select %p26_p12, %s1929_s17, %s28_s8  }
  0x19   : > { %p37_p5 = por %p36_p0, %p35_p13  ;;  %p2043_p7 = por %p133_p2, %p35_p13 }
  0x1a   : > { %2497 = sst [smem:[#allocation17_spill]] %s2039_s9  ;;  %s185_s11 = sand.u32 1, %s1933_s18  }
  0x1b   : > { %s187_s12 = sand.u32 1, %s1929_s17   ;;  %s1588_s14 = sshll.u32 %s1933_s18, 9 }
  0x1c   : > { %s1441_s13 = sshll.u32 %s187_s12, 9  ;;  %s2499_s0 = sld [smem:[#allocation18_spill]] }
  0x1d   : > { %s189_s25 = scalar_lea.vmem [#allocation2], %s1441_s13  ;;  %p2055_p9 = pnand %p1657_p3, %p37_p5 }
  0x1e   : > { %s198_s27 = sshll.u32 %s189_s25, 4  ;;  %s1445_s6 = sshll.u32 %s187_s12, 7  ;;  %s199_s27 = int_to_ptr.vmem [resolvable:$true] %s198_s27 }
  0x1f   : > { %s2059_s7 = scalar_lea.sflag [#allocation3], %s185_s11  ;;  %p1769_p12 = pneg %p2055_p9 }
  0x22   : > { %s195_s24 = scalar_lea.hbm %s2499_s0, %s1588_s14  ;;  %s1772_s20 = scalar_lea.hbm %s2499_s0, 1024 }
  0x23   : > { %s196_s28 = sshll.u32 %s195_s24, 4  ;;  %s197_s28 = int_to_ptr.hbm [resolvable:$true] %s196_s28 }
  0x24   : > { %s1765_s8 = sshra.s32 %s197_s28, 4  ;;  %s1766_s8 = int_to_ptr.hbm [resolvable:$true] %s1765_s8 }
  0x25   : > { %s1767_s1 = scalar_lea.hbm %s1766_s8, 512  ;;  %p1773_p3 = scmp.lt.s32.totalorder %s1766_s8, %s2499_s0 }
  0x26   : > { %p1768_p2 = scmp.ne.s32.totalorder %s1766_s8, %s1767_s1  ;;  %p1774_p5 = scmp.lt.s32.totalorder %s1772_s20, %s1767_s1 }
  0x28   : > { %p1770_p13 = pnand %p1769_p12, %p1768_p2  ;;  %p1775_p11 = por %p1774_p5, %p1773_p3 }
  0x2a   : > { %p1771_p0 = pneg %p1770_p13 }
  0x2c   : > { %p1776_p1 = pnand %p1775_p11, %p1771_p0 }
  0x2e   : > { %1779 = shalt.err (!%p1776_p1)
}
  0x2f   : > { %s1938_s11 = smov 512   ;;  %s1939_s12 = smov 32  }
  0x30   : > { %1647 = dma.hbm_to_vmem [thread:$0]  (!%p2055_p9), %s197_s28, 8192, %s199_s27, %s2059_s7, %s1938_s11, %s1938_s11, %s1939_s12  }
  0x31   : > { %s172_s13 = sshll.u32 %s2482_s3, 4  ;;  %s212_s14 = scalar_lea.vmem [#allocation7], %s1445_s6  ;;  %s173_s13 = int_to_ptr.hbm [resolvable:$true] %s172_s13 }
  0x32   : > { %s2078_s23 = sshll.u32 %s212_s14, 4  ;;  %s1589_s1 = sshll.u32 %s1933_s18, 7  ;;  %s221_s23 = int_to_ptr.vmem [resolvable:$true] %s2078_s23 }
  0x33   : > { %s1940_s8 = smov [#allocation8]   ;;  %s217_s17 = scalar_lea.hbm %s2481_s2, %s1589_s1 }
  0x34   : > { %s174_s20 = sshll.u32 %s1940_s8, 4  ;;  %s218_s30 = sshll.u32 %s217_s17, 4  ;;  %s175_s20 = int_to_ptr.vmem [resolvable:$true] %s174_s20  ;;  %s219_s30 = int_to_ptr.hbm [resolvable:$true] %s218_s30 }
  0x35   : > { %1643 = dma.hbm_to_vmem [thread:$0]  (!%p2021_p10), %s173_s13, 64, %s175_s20, [#allocation6]  }
  0x36   : > { %s1825_s9 = sshra.s32 %s219_s30, 4  ;;  %s1832_s11 = scalar_lea.hbm %s2481_s2, 256  ;;  %s1826_s9 = int_to_ptr.hbm [resolvable:$true] %s1825_s9 }
  0x37   : > { %s1827_s27 = scalar_lea.hbm %s1826_s9, 128  ;;  %p1833_p13 = scmp.lt.s32.totalorder %s1826_s9, %s2481_s2 }
  0x38   : > { %p1828_p1 = scmp.ne.s32.totalorder %s1826_s9, %s1827_s27  ;;  %p1834_p0 = scmp.lt.s32.totalorder %s1832_s11, %s1827_s27 }
  0x3a   : > { %p1830_p11 = pnand %p1828_p1, %p1769_p12  ;;  %p1835_p10 = por %p1834_p0, %p1833_p13 }
  0x3c   : > { %p1831_p2 = pneg %p1830_p11 }
  0x3e   : > { %p1836_p3 = pnand %p1835_p10, %p1831_p2 }
  0x40   : > { %1839 = shalt.err (!%p1836_p3)
}
  0x41   : > { %s1941_s17 = smov 128   ;;  %s1942_s29 = smov 8  }
  0x42   : > { %1650 = dma.hbm_to_vmem [thread:$0]  (!%p2055_p9), %s219_s30, 2048, %s221_s23, %s2059_s7, %s1941_s17, %s1941_s17, %s1942_s29  }
  0x43   : > { %232 = sbr.rel (%p2013_p8) target bundleno = 536 (0x218), region = 36  ;;  %s234_s25 = sand.u32 (!%p2013_p8), 1, %s1991_s19  }
  0x44   : > { %s2103_s13 = sand.u32 (!%p2013_p8), 1, %s1925_s16   ;;  %s235_s1 = scalar_lea.sflag (!%p2013_p8), [#allocation3], %s234_s25 }
  0x45   : > { %s1449_s14 = sshll.u32 (!%p2013_p8), %s2103_s13, 9 }
  0x46   : > { %s2106_s8 = scalar_lea.vmem (!%p2013_p8), [#allocation2], %s1449_s14 }
  0x48   : > { %1900 = dma.done.wait (%p2000_p4), %s235_s1, 8192  }
  0x49   : > { %1902 = vsyncadd (%p2000_p4), %s235_s1, 4294959104  ;;  %p2501_p9 = scmp.eq.s32.totalorder %s1991_s19, 0 }
  0x4b   : > { %1904 = dma.done.wait (%p2501_p9), [#allocation6], 4096   ;;  %p2502_p8 = pmov %p2501_p9 }
  0x4c   : > { %s1451_s26 = sshll.u32 %s2103_s13, 7 }
  0x4d   : > { %1906 = vsyncadd (%p2502_p8), [#allocation6], 4294963200  ;;  %s2119_s30 = scalar_lea.vmem [#allocation7], %s1451_s26 }
  0x4e   : > { %1908 = dma.done.wait (%p2000_p4), %s235_s1, 2048  }
  0x4f   : > { %1910 = vsyncadd (%p2000_p4), %s235_s1, 4294965248  ;;  %p2503_p12 = pmov %p2502_p8 }
  0x50   : > { %p2504_p5 = pmov %p2502_p8 }
  0x51   : > { %1912 = dma.done.wait (%p2503_p12), [#allocation6], 64  }
  0x52   : > { %1914 = vsyncadd (%p2504_p5), [#allocation6], 4294967232  ;;  %v1597_v0 = vld [vmem:[#allocation5 + $0x38] sm:$0xff]  ;;  %v1596_v4 = vld [vmem:[#allocation5 + $0x30] sm:$0xff]  ;;  %s2329_s21 = scalar_lea.vmem [#allocation9], %s1451_s26  ;;  %s1622_s5 = sshll.u32 %s1991_s19, 7 }
  0x53   : > { %v1605_v1 = vld [vmem:[#allocation5 + $0x78] sm:$0xff]  ;;  %644 = vmatpush.bf16.msra.mxu0 %v1597_v0  ;;  %v1604_v5 = vld [vmem:[#allocation5 + $0x70] sm:$0xff]  ;;  %v1595_v8 = vld [vmem:[#allocation5 + $0x28] sm:$0xff]  ;;  %s1320_s20 = scalar_lea.hbm %s2483_s4, %s1622_s5  ;;  %s1321_s19 = sshll.u32 %s2329_s21, 4  ;;  %s1322_s19 = int_to_ptr.vmem [resolvable:$true] %s1321_s19 }
  0x54   : > { %v1613_v2 = vld [vmem:[#allocation5 + $0xb8] sm:$0xff]  ;;  %693 = vmatpush.bf16.msra.mxu1 %v1605_v1  ;;  %v1612_v6 = vld [vmem:[#allocation5 + $0xb0] sm:$0xff]  ;;  %v1603_v9 = vld [vmem:[#allocation5 + $0x68] sm:$0xff]  ;;  %s1323_s24 = sshll.u32 %s1320_s20, 4  ;;  %s1309_s9 = scalar_lea.sflag [#allocation4], %s2103_s13  ;;  %s1324_s24 = int_to_ptr.hbm [resolvable:$true] %s1323_s24 }
  0x55   : > { %v1621_v3 = vld [vmem:[#allocation5 + $0xf8] sm:$0xff]  ;;  %742 = vmatpush.bf16.msra.mxu2 %v1613_v2  ;;  %v1620_v7 = vld [vmem:[#allocation5 + $0xf0] sm:$0xff]  ;;  %v1611_v10 = vld [vmem:[#allocation5 + $0xa8] sm:$0xff]  ;;  %s1869_s27 = sshra.s32 %s1324_s24, 4  ;;  %s1875_s0 = scalar_lea.hbm %s2483_s4, 256  ;;  %s1870_s27 = int_to_ptr.hbm [resolvable:$true] %s1869_s27 }
  0x56   : > { %791 = vmatpush.bf16.msra.mxu3 %v1621_v3  ;;  %v1619_v11 = vld [vmem:[#allocation5 + $0xe8] sm:$0xff]  ;;  %v1594_v12 = vld [vmem:[#allocation5 + $0x20] sm:$0xff]  ;;  %v1593_v16 = vld [vmem:[#allocation5 + $0x18] sm:$0xff]  ;;  %s1871_s28 = scalar_lea.hbm %s1870_s27, 128  ;;  %p1876_p2 = scmp.lt.s32.totalorder %s1870_s27, %s2483_s4 }
  0x57   : > { %645 = vmatpush.bf16.msra.mxu0 %v1596_v4  ;;  %v1602_v13 = vld [vmem:[#allocation5 + $0x60] sm:$0xff]  ;;  %v1601_v17 = vld [vmem:[#allocation5 + $0x58] sm:$0xff]  ;;  %v1592_v20 = vld [vmem:[#allocation5 + $0x10] sm:$0xff]  ;;  %p1872_p4 = scmp.ne.s32.totalorder %s1870_s27, %s1871_s28  ;;  %p1877_p13 = scmp.lt.s32.totalorder %s1875_s0, %s1871_s28 }
  0x58   : > { %694 = vmatpush.bf16.msra.mxu1 %v1604_v5  ;;  %v1610_v14 = vld [vmem:[#allocation5 + $0xa0] sm:$0xff]  ;;  %v1609_v18 = vld [vmem:[#allocation5 + $0x98] sm:$0xff]  ;;  %v1600_v21 = vld [vmem:[#allocation5 + $0x50] sm:$0xff] }
  0x59   : > { %743 = vmatpush.bf16.msra.mxu2 %v1612_v6  ;;  %v1618_v15 = vld [vmem:[#allocation5 + $0xe0] sm:$0xff]  ;;  %v1617_v19 = vld [vmem:[#allocation5 + $0xd8] sm:$0xff]  ;;  %v1608_v22 = vld [vmem:[#allocation5 + $0x90] sm:$0xff]  ;;  %p1873_p1 = pnand %p1872_p4, %p2043_p7  ;;  %p1878_p0 = por %p1877_p13, %p1876_p2 }
  0x5a   : > { %792 = vmatpush.bf16.msra.mxu3 %v1620_v7  ;;  %v1616_v23 = vld [vmem:[#allocation5 + $0xd0] sm:$0xff]  ;;  %v1591_v24 = vld [vmem:[#allocation5 + $0x8] sm:$0xff]  ;;  %v1590_v28 = vld [vmem:[#allocation5] sm:$0xff] }
  0x5b   : > { %646 = vmatpush.bf16.msra.mxu0 %v1595_v8  ;;  %v1599_v25 = vld [vmem:[#allocation5 + $0x48] sm:$0xff]  ;;  %v1598_v29 = vld [vmem:[#allocation5 + $0x40] sm:$0xff]  ;;  %v294_v36 = vld [vmem:[%s2106_s8 + $0x10] sm:$0xff]  ;;  %p1874_p11 = pneg %p1873_p1 }
  0x5c   : > { %695 = vmatpush.bf16.msra.mxu1 %v1603_v9  ;;  %v1607_v26 = vld [vmem:[#allocation5 + $0x88] sm:$0xff]  ;;  %v1606_v30 = vld [vmem:[#allocation5 + $0x80] sm:$0xff]  ;;  %v298_v37 = vld [vmem:[%s2106_s8 + $0x30] sm:$0xff] }
  0x5d   : > { %744 = vmatpush.bf16.msra.mxu2 %v1611_v10  ;;  %v1615_v27 = vld [vmem:[#allocation5 + $0xc8] sm:$0xff]  ;;  %v1614_v31 = vld [vmem:[#allocation5 + $0xc0] sm:$0xff]  ;;  %v295_v38 = vld [vmem:[%s2106_s8 + $0x18] sm:$0xff]  ;;  %v358_v42 = vpack.c.bf16 %v298_v37, %v294_v36  ;;  %p1879_p10 = pnand %p1878_p0, %p1874_p11 }
  0x5e   : > { %793 = vmatpush.bf16.msra.mxu3 %v1619_v11  ;;  %v292_v32 = vld [vmem:[%s2106_s8] sm:$0xff]  ;;  %v293_v34 = vld [vmem:[%s2106_s8 + $0x8] sm:$0xff]  ;;  %v299_v39 = vld [vmem:[%s2106_s8 + $0x38] sm:$0xff] }
  0x5f   : > { %647 = vmatpush.bf16.msra.mxu0 %v1594_v12  ;;  %v296_v33 = vld [vmem:[%s2106_s8 + $0x20] sm:$0xff]  ;;  %v297_v35 = vld [vmem:[%s2106_s8 + $0x28] sm:$0xff]  ;;  %v359_v43 = vpack.c.bf16 %v299_v39, %v295_v38  ;;  %v302_v48 = vld [vmem:[%s2106_s8 + $0x50] sm:$0xff] }
  0x60   : > { %696 = vmatpush.bf16.msra.mxu1 %v1602_v13  ;;  %v356_v40 = vpack.c.bf16 %v296_v33, %v292_v32  ;;  %v357_v41 = vpack.c.bf16 %v297_v35, %v293_v34  ;;  %v300_v44 = vld [vmem:[%s2106_s8 + $0x40] sm:$0xff]  ;;  %v301_v46 = vld [vmem:[%s2106_s8 + $0x48] sm:$0xff]  ;;  %v306_v49 = vld [vmem:[%s2106_s8 + $0x70] sm:$0xff] }
  0x61   : > { %745 = vmatpush.bf16.msra.mxu2 %v1610_v14  ;;  %v304_v45 = vld [vmem:[%s2106_s8 + $0x60] sm:$0xff]  ;;  %v305_v47 = vld [vmem:[%s2106_s8 + $0x68] sm:$0xff]  ;;  %v303_v50 = vld [vmem:[%s2106_s8 + $0x58] sm:$0xff]  ;;  %v362_v54 = vpack.c.bf16 %v306_v49, %v302_v48 }
  0x62   : > { %794 = vmatpush.bf16.msra.mxu3 %v1618_v15  ;;  %v307_v51 = vld [vmem:[%s2106_s8 + $0x78] sm:$0xff]  ;;  %v360_v52 = vpack.c.bf16 %v304_v45, %v300_v44  ;;  %v361_v53 = vpack.c.bf16 %v305_v47, %v301_v46  ;;  %v308_v56 = vld [vmem:[%s2106_s8 + $0x80] sm:$0xff]  ;;  %v309_v58 = vld [vmem:[%s2106_s8 + $0x88] sm:$0xff] }
  0x63   : > { %648 = vmatpush.bf16.msra.mxu0 %v1593_v16  ;;  %v363_v55 = vpack.c.bf16 %v307_v51, %v303_v50  ;;  %v312_v57 = vld [vmem:[%s2106_s8 + $0xa0] sm:$0xff]  ;;  %v313_v59 = vld [vmem:[%s2106_s8 + $0xa8] sm:$0xff]  ;;  %v310_v60 = vld [vmem:[%s2106_s8 + $0x90] sm:$0xff] }
  0x64   : > { %697 = vmatpush.bf16.msra.mxu1 %v1601_v17  ;;  %v314_v61 = vld [vmem:[%s2106_s8 + $0xb0] sm:$0xff]  ;;  %v311_v62 = vld [vmem:[%s2106_s8 + $0x98] sm:$0xff]  ;;  %v364_v0 = vpack.c.bf16 %v312_v57, %v308_v56  ;;  %v365_v1 = vpack.c.bf16 %v313_v59, %v309_v58  ;;  %v316_v4 = vld [vmem:[%s2106_s8 + $0xc0] sm:$0xff] }
  0x65   : > { %746 = vmatpush.bf16.msra.mxu2 %v1609_v18  ;;  %v315_v63 = vld [vmem:[%s2106_s8 + $0xb8] sm:$0xff]  ;;  %v366_v2 = vpack.c.bf16 %v314_v61, %v310_v60  ;;  %v320_v5 = vld [vmem:[%s2106_s8 + $0xe0] sm:$0xff]  ;;  %v317_v6 = vld [vmem:[%s2106_s8 + $0xc8] sm:$0xff] }
  0x66   : > { %795 = vmatpush.bf16.msra.mxu3 %v1617_v19  ;;  %v367_v3 = vpack.c.bf16 %v315_v63, %v311_v62  ;;  %v321_v7 = vld [vmem:[%s2106_s8 + $0xe8] sm:$0xff]  ;;  %v318_v8 = vld [vmem:[%s2106_s8 + $0xd0] sm:$0xff]  ;;  %v319_v10 = vld [vmem:[%s2106_s8 + $0xd8] sm:$0xff]  ;;  %v368_v12 = vpack.c.bf16 %v320_v5, %v316_v4 }
  0x67   : > { %649 = vmatpush.bf16.msra.mxu0 %v1592_v20  ;;  %v322_v9 = vld [vmem:[%s2106_s8 + $0xf0] sm:$0xff]  ;;  %v323_v11 = vld [vmem:[%s2106_s8 + $0xf8] sm:$0xff]  ;;  %v369_v13 = vpack.c.bf16 %v321_v7, %v317_v6  ;;  %v324_v16 = vld [vmem:[%s2106_s8 + $0x100] sm:$0xff] }
  0x68   : > { %698 = vmatpush.bf16.msra.mxu1 %v1600_v21  ;;  %v370_v14 = vpack.c.bf16 %v322_v9, %v318_v8  ;;  %v371_v15 = vpack.c.bf16 %v323_v11, %v319_v10  ;;  %v328_v17 = vld [vmem:[%s2106_s8 + $0x120] sm:$0xff]  ;;  %v325_v18 = vld [vmem:[%s2106_s8 + $0x108] sm:$0xff]  ;;  %v326_v20 = vld [vmem:[%s2106_s8 + $0x110] sm:$0xff] }
  0x69   : > { %747 = vmatpush.bf16.msra.mxu2 %v1608_v22  ;;  %v329_v19 = vld [vmem:[%s2106_s8 + $0x128] sm:$0xff]  ;;  %v330_v21 = vld [vmem:[%s2106_s8 + $0x130] sm:$0xff]  ;;  %v327_v22 = vld [vmem:[%s2106_s8 + $0x118] sm:$0xff] }
  0x6a   : > { %796 = vmatpush.bf16.msra.mxu3 %v1616_v23  ;;  %v331_v23 = vld [vmem:[%s2106_s8 + $0x138] sm:$0xff]  ;;  %v334_v32 = vld [vmem:[%s2106_s8 + $0x150] sm:$0xff]  ;;  %v2193_v5 = vld [vmem:[#allocation8] sm:$0x7] }
  0x6b   : > { %650 = vmatpush.bf16.msra.mxu0 %v1591_v24  ;;  %v372_v24 = vpack.c.bf16 %v328_v17, %v324_v16  ;;  %v338_v33 = vld [vmem:[%s2106_s8 + $0x170] sm:$0xff]  ;;  %v335_v34 = vld [vmem:[%s2106_s8 + $0x158] sm:$0xff]  ;;  %v841_v9 = vld [vmem:[%s2119_s30] sm:$0xff]  ;;  %v2197_v11 = vperm.slane %v2193_v5, 0 }
  0x6c   : > { %699 = vmatpush.bf16.msra.mxu1 %v1599_v25  ;;  %v373_v25 = vpack.c.bf16 %v329_v19, %v325_v18  ;;  %v339_v35 = vld [vmem:[%s2106_s8 + $0x178] sm:$0xff]  ;;  %v378_v38 = vpack.c.bf16 %v338_v33, %v334_v32  ;;  %v342_v44 = vld [vmem:[%s2106_s8 + $0x190] sm:$0xff] }
  0x6d   : > { %748 = vmatpush.bf16.msra.mxu2 %v1607_v26  ;;  %v374_v26 = vpack.c.bf16 %v330_v21, %v326_v20  ;;  %v379_v39 = vpack.c.bf16 %v339_v35, %v335_v34  ;;  %v346_v45 = vld [vmem:[%s2106_s8 + $0x1b0] sm:$0xff]  ;;  %v343_v46 = vld [vmem:[%s2106_s8 + $0x198] sm:$0xff]  ;;  %v842_v21 = vld [vmem:[%s2119_s30 + $0x8] sm:$0xff] }
  0x6e   : > { %797 = vmatpush.bf16.msra.mxu3 %v1615_v27  ;;  %v375_v27 = vpack.c.bf16 %v331_v23, %v327_v22  ;;  %v347_v47 = vld [vmem:[%s2106_s8 + $0x1b8] sm:$0xff]  ;;  %v382_v50 = vpack.c.bf16 %v346_v45, %v342_v44  ;;  %v350_v56 = vld [vmem:[%s2106_s8 + $0x1d0] sm:$0xff] }
  0x6f   : > { %651 = vmatpush.bf16.msra.mxu0 %v1590_v28  ;;  %v332_v28 = vld [vmem:[%s2106_s8 + $0x140] sm:$0xff]  ;;  %v383_v51 = vpack.c.bf16 %v347_v47, %v343_v46  ;;  %v354_v57 = vld [vmem:[%s2106_s8 + $0x1f0] sm:$0xff]  ;;  %v351_v58 = vld [vmem:[%s2106_s8 + $0x1d8] sm:$0xff] }
  0x70   : > { %700 = vmatpush.bf16.msra.mxu1 %v1598_v29  ;;  %v336_v29 = vld [vmem:[%s2106_s8 + $0x160] sm:$0xff]  ;;  %v355_v59 = vld [vmem:[%s2106_s8 + $0x1f8] sm:$0xff]  ;;  %v386_v62 = vpack.c.bf16 %v354_v57, %v350_v56  ;;  %v843_v32 = vld [vmem:[%s2119_s30 + $0x10] sm:$0xff] }
  0x71   : > { %749 = vmatpush.bf16.msra.mxu2 %v1606_v30  ;;  %v333_v30 = vld [vmem:[%s2106_s8 + $0x148] sm:$0xff]  ;;  %v376_v36 = vpack.c.bf16 %v336_v29, %v332_v28  ;;  %v387_v63 = vpack.c.bf16 %v355_v59, %v351_v58 }
  0x72   : > { %798 = vmatpush.bf16.msra.mxu3 %v1614_v31  ;;  %652 = vmatmul.bf16.vlgmr.msra.gmra.mxu0 %v356_v40  ;;  %v337_v31 = vld [vmem:[%s2106_s8 + $0x168] sm:$0xff]  ;;  %v340_v40 = vld [vmem:[%s2106_s8 + $0x180] sm:$0xff] }
  0x73   : > { %701 = vmatmul.bf16.vlgmr.msra.gmra.mxu1 %v357_v41  ;;  %v377_v37 = vpack.c.bf16 %v337_v31, %v333_v30  ;;  %v344_v41 = vld [vmem:[%s2106_s8 + $0x1a0] sm:$0xff] }
  0x74   : > { %750 = vmatmul.bf16.vlgmr.msra.gmra.mxu2 %v358_v42  ;;  %v341_v42 = vld [vmem:[%s2106_s8 + $0x188] sm:$0xff]  ;;  %v380_v48 = vpack.c.bf16 %v344_v41, %v340_v40 }
  0x75   : > { %799 = vmatmul.bf16.vlgmr.msra.gmra.mxu3 %v359_v43  ;;  %v345_v43 = vld [vmem:[%s2106_s8 + $0x1a8] sm:$0xff] }
  0x76   : > { %v381_v49 = vpack.c.bf16 %v345_v43, %v341_v42  ;;  %v844_v43 = vld [vmem:[%s2119_s30 + $0x18] sm:$0xff] }
  0x82   : > { %657 = vmatmul.bf16.gmra.mxu0 %v360_v52  ;;  %v348_v52 = vld [vmem:[%s2106_s8 + $0x1c0] sm:$0xff] }
  0x83   : > { %706 = vmatmul.bf16.gmra.mxu1 %v361_v53  ;;  %v352_v53 = vld [vmem:[%s2106_s8 + $0x1e0] sm:$0xff] }
  0x84   : > { %755 = vmatmul.bf16.gmra.mxu2 %v362_v54  ;;  %v349_v54 = vld [vmem:[%s2106_s8 + $0x1c8] sm:$0xff]  ;;  %v384_v60 = vpack.c.bf16 %v352_v53, %v348_v52  ;;  %v845_v53 = vld [vmem:[%s2119_s30 + $0x20] sm:$0xff] }
  0x85   : > { %804 = vmatmul.bf16.gmra.mxu3 %v363_v55  ;;  %v353_v55 = vld [vmem:[%s2106_s8 + $0x1e8] sm:$0xff] }
  0x86   : > { %v385_v61 = vpack.c.bf16 %v353_v55, %v349_v54 }
  0x92   : > { %662 = vmatmul.bf16.gmra.mxu0 %v364_v0 }
  0x93   : > { %711 = vmatmul.bf16.gmra.mxu1 %v365_v1 }
  0x94   : > { %760 = vmatmul.bf16.gmra.mxu2 %v366_v2 }
  0x95   : > { %809 = vmatmul.bf16.gmra.mxu3 %v367_v3 }
  0xa2   : > { %667 = vmatmul.bf16.gmra.mxu0 %v368_v12 }
  0xa3   : > { %716 = vmatmul.bf16.gmra.mxu1 %v369_v13 }
  0xa4   : > { %765 = vmatmul.bf16.gmra.mxu2 %v370_v14 }
  0xa5   : > { %814 = vmatmul.bf16.gmra.mxu3 %v371_v15 }
  0xb2   : > { %672 = vmatmul.bf16.gmra.mxu0 %v372_v24 }
  0xb3   : > { %721 = vmatmul.bf16.gmra.mxu1 %v373_v25 }
  0xb4   : > { %770 = vmatmul.bf16.gmra.mxu2 %v374_v26 }
  0xb5   : > { %819 = vmatmul.bf16.gmra.mxu3 %v375_v27 }
  0xc2   : > { %677 = vmatmul.bf16.gmra.mxu0 %v376_v36 }
  0xc3   : > { %726 = vmatmul.bf16.gmra.mxu1 %v377_v37 }
  0xc4   : > { %775 = vmatmul.bf16.gmra.mxu2 %v378_v38 }
  0xc5   : > { %824 = vmatmul.bf16.gmra.mxu3 %v379_v39 }
  0xd2   : > { %682 = vmatmul.bf16.gmra.mxu0 %v380_v48 }
  0xd3   : > { %731 = vmatmul.bf16.gmra.mxu1 %v381_v49 }
  0xd4   : > { %780 = vmatmul.bf16.gmra.mxu2 %v382_v50 }
  0xd5   : > { %829 = vmatmul.bf16.gmra.mxu3 %v383_v51 }
  0xe2   : > { %687 = vmatmul.bf16.gmra.mxu0 %v384_v60 }
  0xe3   : > { %736 = vmatmul.bf16.gmra.mxu1 %v385_v61 }
  0xe4   : > { %785 = vmatmul.bf16.gmra.mxu2 %v386_v62 }
  0xe5   : > { %834 = vmatmul.bf16.gmra.mxu3 %v387_v63 }
  0xef   : > { %v653_v0 = vpop.f32.mrf.mxu0 }
  0xf0   : > { %v702_v1 = vpop.f32.mrf.mxu1 }
  0xf1   : > { %v703_v2 = vadd.f32 %v702_v1, %v653_v0  ;;  %v846_v0 = vld [vmem:[%s2119_s30 + $0x28] sm:$0xff] }
  0xf7   : > { %v751_v3 = vpop.f32.mrf.mxu2  ;;  %v655_v7 = vpop.f32.mrf.mxu0 }
  0xf8   : > { %v800_v4 = vpop.f32.mrf.mxu3  ;;  %v752_v6 = vadd.f32 %v751_v3, %v703_v2  ;;  %v704_v8 = vpop.f32.mrf.mxu1 }
  0xf9   : > { %v705_v13 = vadd.f32 %v704_v8, %v655_v7 }
  0xfa   : > { %v801_v10 = vadd.f32 %v800_v4, %v752_v6 }
  0xfc   : > { %v857_v12 = vadd.f32 %v841_v9, %v801_v10 }
  0xfe   : > { %v2200_v14 = vadd.f32 %v2197_v11, %v857_v12 }
  0xff   : > { %v753_v15 = vpop.f32.mrf.mxu2  ;;  %v658_v18 = vpop.f32.mrf.mxu0 }
 0x100   : > { %v802_v16 = vpop.f32.mrf.mxu3  ;;  %v754_v17 = vadd.f32 %v753_v15, %v705_v13  ;;  %890 = vadd.xlane.f32.xlu0 %v2200_v14  ;;  %v707_v19 = vpop.f32.mrf.mxu1  ;;  %v938_v20 = vmul.f32 %v2200_v14, %v2200_v14  ;;  %v847_v15 = vld [vmem:[%s2119_s30 + $0x30] sm:$0xff] }
 0x101   : > { %v708_v24 = vadd.f32 %v707_v19, %v658_v18 }
 0x102   : > { %v803_v22 = vadd.f32 %v802_v16, %v754_v17  ;;  %954 = vadd.xlane.f32.xlu1 %v938_v20 }
 0x104   : > { %v858_v23 = vadd.f32 %v842_v21, %v803_v22 }
 0x106   : > { %v2207_v25 = vadd.f32 %v2197_v11, %v858_v23 }
 0x107   : > { %v756_v26 = vpop.f32.mrf.mxu2  ;;  %v660_v29 = vpop.f32.mrf.mxu0 }
 0x108   : > { %v805_v27 = vpop.f32.mrf.mxu3  ;;  %v757_v28 = vadd.f32 %v756_v26, %v708_v24  ;;  %892 = vadd.xlane.f32.xlu0 %v2207_v25  ;;  %v709_v30 = vpop.f32.mrf.mxu1  ;;  %v939_v31 = vmul.f32 %v2207_v25, %v2207_v25 }
 0x109   : > { %v710_v35 = vadd.f32 %v709_v30, %v660_v29 }
 0x10a   : > { %v806_v33 = vadd.f32 %v805_v27, %v757_v28  ;;  %956 = vadd.xlane.f32.xlu2 %v939_v31  ;;  %v848_v27 = vld [vmem:[%s2119_s30 + $0x38] sm:$0xff] }
 0x10c   : > { %v859_v34 = vadd.f32 %v843_v32, %v806_v33 }
 0x10e   : > { %v2214_v36 = vadd.f32 %v2197_v11, %v859_v34 }
 0x10f   : > { %v758_v37 = vpop.f32.mrf.mxu2  ;;  %v663_v40 = vpop.f32.mrf.mxu0 }
 0x110   : > { %v807_v38 = vpop.f32.mrf.mxu3  ;;  %v759_v39 = vadd.f32 %v758_v37, %v710_v35  ;;  %894 = vadd.xlane.f32.xlu1 %v2214_v36  ;;  %v712_v41 = vpop.f32.mrf.mxu1  ;;  %v940_v42 = vmul.f32 %v2214_v36, %v2214_v36 }
 0x111   : > { %v713_v46 = vadd.f32 %v712_v41, %v663_v40 }
 0x112   : > { %v808_v44 = vadd.f32 %v807_v38, %v759_v39  ;;  %958 = vadd.xlane.f32.xlu0 %v940_v42  ;;  %v849_v39 = vld [vmem:[%s2119_s30 + $0x40] sm:$0xff] }
 0x114   : > { %v860_v45 = vadd.f32 %v844_v43, %v808_v44 }
 0x116   : > { %v2221_v47 = vadd.f32 %v2197_v11, %v860_v45 }
 0x117   : > { %v761_v48 = vpop.f32.mrf.mxu2  ;;  %v665_v51 = vpop.f32.mrf.mxu0 }
 0x118   : > { %v810_v49 = vpop.f32.mrf.mxu3  ;;  %v762_v50 = vadd.f32 %v761_v48, %v713_v46  ;;  %896 = vadd.xlane.f32.xlu1 %v2221_v47  ;;  %v714_v52 = vpop.f32.mrf.mxu1  ;;  %v941_v57 = vmul.f32 %v2221_v47, %v2221_v47 }
 0x119   : > { %v715_v56 = vadd.f32 %v714_v52, %v665_v51  ;;  %v850_v51 = vld [vmem:[%s2119_s30 + $0x48] sm:$0xff] }
 0x11a   : > { %v811_v54 = vadd.f32 %v810_v49, %v762_v50 }
 0x11c   : > { %v861_v55 = vadd.f32 %v845_v53, %v811_v54 }
 0x11e   : > { %v2228_v58 = vadd.f32 %v2197_v11, %v861_v55 }
 0x11f   : > { %v763_v59 = vpop.f32.mrf.mxu2  ;;  %v668_v62 = vpop.f32.mrf.mxu0 }
 0x120   : > { %v812_v60 = vpop.f32.mrf.mxu3  ;;  %v764_v61 = vadd.f32 %v763_v59, %v715_v56  ;;  %960 = vadd.xlane.f32.xlu1 %v941_v57  ;;  %898 = vadd.xlane.f32.xlu2 %v2228_v58  ;;  %v717_v63 = vpop.f32.mrf.mxu1  ;;  %v942_v6 = vmul.f32 %v2228_v58, %v2228_v58 }
 0x121   : > { %v718_v3 = vadd.f32 %v717_v63, %v668_v62  ;;  %v851_v63 = vld [vmem:[%s2119_s30 + $0x50] sm:$0xff] }
 0x122   : > { %v813_v1 = vadd.f32 %v812_v60, %v764_v61 }
 0x124   : > { %v862_v2 = vadd.f32 %v846_v0, %v813_v1 }
 0x126   : > { %v2233_v4 = vadd.f32 %v2197_v11, %v862_v2 }
 0x127   : > { %v766_v7 = vpop.f32.mrf.mxu2  ;;  %v670_v10 = vpop.f32.mrf.mxu0 }
 0x128   : > { %v815_v8 = vpop.f32.mrf.mxu3  ;;  %v767_v9 = vadd.f32 %v766_v7, %v718_v3  ;;  %962 = vadd.xlane.f32.xlu2 %v942_v6  ;;  %v719_v12 = vpop.f32.mrf.mxu1  ;;  %v943_v13 = vmul.f32 %v2233_v4, %v2233_v4 }
 0x129   : > { %v720_v18 = vadd.f32 %v719_v12, %v670_v10 }
 0x12a   : > { %v816_v16 = vadd.f32 %v815_v8, %v767_v9  ;;  %964 = vadd.xlane.f32.xlu0 %v943_v13  ;;  %v852_v13 = vld [vmem:[%s2119_s30 + $0x58] sm:$0xff] }
 0x12c   : > { %v863_v17 = vadd.f32 %v847_v15, %v816_v16 }
 0x12e   : > { %v2241_v19 = vadd.f32 %v2197_v11, %v863_v17 }
 0x12f   : > { %v768_v20 = vpop.f32.mrf.mxu2  ;;  %v673_v23 = vpop.f32.mrf.mxu0 }
 0x130   : > { %v817_v21 = vpop.f32.mrf.mxu3  ;;  %v769_v22 = vadd.f32 %v768_v20, %v720_v18  ;;  %900 = vadd.xlane.f32.xlu2 %v2233_v4  ;;  %v722_v24 = vpop.f32.mrf.mxu1  ;;  %v944_v26 = vmul.f32 %v2241_v19, %v2241_v19 }
 0x131   : > { %v723_v30 = vadd.f32 %v722_v24, %v673_v23 }
 0x132   : > { %v818_v28 = vadd.f32 %v817_v21, %v769_v22  ;;  %902 = vadd.xlane.f32.xlu0 %v2241_v19  ;;  %966 = vadd.xlane.f32.xlu1 %v944_v26 }
 0x134   : > { %v864_v29 = vadd.f32 %v848_v27, %v818_v28  ;;  %v853_v27 = vld [vmem:[%s2119_s30 + $0x60] sm:$0xff] }
 0x136   : > { %v2249_v31 = vadd.f32 %v2197_v11, %v864_v29 }
 0x137   : > { %v771_v32 = vpop.f32.mrf.mxu2  ;;  %v675_v35 = vpop.f32.mrf.mxu0 }
 0x138   : > { %v820_v33 = vpop.f32.mrf.mxu3  ;;  %v772_v34 = vadd.f32 %v771_v32, %v723_v30  ;;  %v724_v37 = vpop.f32.mrf.mxu1  ;;  %v945_v38 = vmul.f32 %v2249_v31, %v2249_v31 }
 0x139   : > { %v725_v42 = vadd.f32 %v724_v37, %v675_v35 }
 0x13a   : > { %v821_v40 = vadd.f32 %v820_v33, %v772_v34  ;;  %904 = vadd.xlane.f32.xlu1 %v2249_v31  ;;  %968 = vadd.xlane.f32.xlu2 %v945_v38  ;;  %v854_v38 = vld [vmem:[%s2119_s30 + $0x68] sm:$0xff] }
 0x13c   : > { %v865_v41 = vadd.f32 %v849_v39, %v821_v40 }
 0x13e   : > { %v2256_v43 = vadd.f32 %v2197_v11, %v865_v41 }
 0x13f   : > { %v773_v44 = vpop.f32.mrf.mxu2  ;;  %v678_v48 = vpop.f32.mrf.mxu0 }
 0x140   : > { %v822_v45 = vpop.f32.mrf.mxu3  ;;  %v774_v46 = vadd.f32 %v773_v44, %v725_v42  ;;  %v727_v49 = vpop.f32.mrf.mxu1  ;;  %v946_v50 = vmul.f32 %v2256_v43, %v2256_v43 }
 0x141   : > { %v728_v54 = vadd.f32 %v727_v49, %v678_v48 }
 0x142   : > { %v823_v52 = vadd.f32 %v822_v45, %v774_v46  ;;  %906 = vadd.xlane.f32.xlu2 %v2256_v43  ;;  %970 = vadd.xlane.f32.xlu0 %v946_v50  ;;  %v855_v50 = vld [vmem:[%s2119_s30 + $0x70] sm:$0xff] }
 0x144   : > { %v866_v53 = vadd.f32 %v850_v51, %v823_v52 }
 0x146   : > { %v2263_v55 = vadd.f32 %v2197_v11, %v866_v53 }
 0x147   : > { %v776_v56 = vpop.f32.mrf.mxu2  ;;  %v680_v60 = vpop.f32.mrf.mxu0 }
 0x148   : > { %v825_v57 = vpop.f32.mrf.mxu3  ;;  %v777_v59 = vadd.f32 %v776_v56, %v728_v54  ;;  %v729_v61 = vpop.f32.mrf.mxu1  ;;  %v947_v62 = vmul.f32 %v2263_v55, %v2263_v55 }
 0x149   : > { %v730_v2 = vadd.f32 %v729_v61, %v680_v60 }
 0x14a   : > { %v826_v0 = vadd.f32 %v825_v57, %v777_v59  ;;  %908 = vadd.xlane.f32.xlu0 %v2263_v55  ;;  %972 = vadd.xlane.f32.xlu1 %v947_v62  ;;  %v856_v62 = vld [vmem:[%s2119_s30 + $0x78] sm:$0xff] }
 0x14c   : > { %v867_v1 = vadd.f32 %v851_v63, %v826_v0 }
 0x14e   : > { %v2270_v3 = vadd.f32 %v2197_v11, %v867_v1 }
 0x14f   : > { %v778_v6 = vpop.f32.mrf.mxu2  ;;  %v683_v9 = vpop.f32.mrf.mxu0 }
 0x150   : > { %v827_v7 = vpop.f32.mrf.mxu3  ;;  %v779_v8 = vadd.f32 %v778_v6, %v730_v2  ;;  %v732_v10 = vpop.f32.mrf.mxu1  ;;  %v948_v12 = vmul.f32 %v2270_v3, %v2270_v3 }
 0x151   : > { %v733_v17 = vadd.f32 %v732_v10, %v683_v9 }
 0x152   : > { %v828_v15 = vadd.f32 %v827_v7, %v779_v8  ;;  %910 = vadd.xlane.f32.xlu1 %v2270_v3  ;;  %974 = vadd.xlane.f32.xlu2 %v948_v12 }
 0x154   : > { %v868_v16 = vadd.f32 %v852_v13, %v828_v15 }
 0x156   : > { %v2277_v18 = vadd.f32 %v2197_v11, %v868_v16 }
 0x157   : > { %v781_v20 = vpop.f32.mrf.mxu2  ;;  %v685_v23 = vpop.f32.mrf.mxu0 }
 0x158   : > { %v830_v21 = vpop.f32.mrf.mxu3  ;;  %v782_v22 = vadd.f32 %v781_v20, %v733_v17  ;;  %v734_v24 = vpop.f32.mrf.mxu1  ;;  %v949_v26 = vmul.f32 %v2277_v18, %v2277_v18 }
 0x159   : > { %v735_v30 = vadd.f32 %v734_v24, %v685_v23 }
 0x15a   : > { %v831_v28 = vadd.f32 %v830_v21, %v782_v22  ;;  %912 = vadd.xlane.f32.xlu2 %v2277_v18  ;;  %976 = vadd.xlane.f32.xlu0 %v949_v26 }
 0x15c   : > { %v869_v29 = vadd.f32 %v853_v27, %v831_v28 }
 0x15e   : > { %v2284_v32 = vadd.f32 %v2197_v11, %v869_v29 }
 0x15f   : > { %v783_v33 = vpop.f32.mrf.mxu2  ;;  %v688_v39 = vpop.f32.mrf.mxu0 }
 0x160   : > { %v832_v34 = vpop.f32.mrf.mxu3  ;;  %v784_v35 = vadd.f32 %v783_v33, %v735_v30  ;;  %v950_v37 = vmul.f32 %v2284_v32, %v2284_v32  ;;  %v737_v40 = vpop.f32.mrf.mxu1 }
 0x161   : > { %v738_v44 = vadd.f32 %v737_v40, %v688_v39 }
 0x162   : > { %v833_v41 = vadd.f32 %v832_v34, %v784_v35  ;;  %914 = vadd.xlane.f32.xlu0 %v2284_v32  ;;  %978 = vadd.xlane.f32.xlu1 %v950_v37 }
 0x164   : > { %v870_v42 = vadd.f32 %v854_v38, %v833_v41 }
 0x166   : > { %v2291_v49 = vadd.f32 %v2197_v11, %v870_v42 }
 0x167   : > { %v786_v45 = vpop.f32.mrf.mxu2  ;;  %v690_v52 = vpop.f32.mrf.mxu0 }
 0x168   : > { %v835_v46 = vpop.f32.mrf.mxu3  ;;  %v787_v48 = vadd.f32 %v786_v45, %v738_v44  ;;  %v739_v53 = vpop.f32.mrf.mxu1  ;;  %v951_v9 = vmul.f32 %v2291_v49, %v2291_v49 }
 0x169   : > { %v740_v56 = vadd.f32 %v739_v53, %v690_v52 }
 0x16a   : > { %v836_v51 = vadd.f32 %v835_v46, %v787_v48  ;;  %916 = vadd.xlane.f32.xlu1 %v2291_v49 }
 0x16c   : > { %v871_v54 = vadd.f32 %v855_v50, %v836_v51  ;;  %v2315_v50 = vperm.slane %v2193_v5, 1 }
 0x16e   : > { %v2296_v57 = vadd.f32 %v2197_v11, %v871_v54  ;;  %v2319_v54 = vperm.slane %v2193_v5, 2 }
 0x16f   : > { %v788_v59 = vpop.f32.mrf.mxu2 }
 0x170   : > { %v789_v60 = vadd.f32 %v788_v59, %v740_v56  ;;  %918 = vadd.xlane.f32.xlu2 %v2296_v57  ;;  %v837_v61 = vpop.f32.mrf.mxu3  ;;  %v952_v23 = vmul.f32 %v2296_v57, %v2296_v57 }
 0x172   : > { %v838_v63 = vadd.f32 %v837_v61, %v789_v60 }
 0x173   : > { %v891_v0 = vpop.xlane.xlu0 %890 }
 0x174   : > { %v872_v1 = vadd.f32 %v856_v62, %v838_v63  ;;  %v922_v2 = vmul.f32 0.0078125, %v891_v0 }
 0x175   : > { %v955_v6 = vpop.xlane.xlu1 %954 }
 0x176   : > { %v1002_v7 = vmul.f32 %v922_v2, %v922_v2  ;;  %v986_v8 = vmul.f32 0.0078125, %v955_v6  ;;  %v2303_v10 = vadd.f32 %v2197_v11, %v872_v1  ;;  %v1050_v51 = vsub.f32 %v2200_v14, %v922_v2 }
 0x178   : > { %v1018_v12 = vsub.f32 %v986_v8, %v1002_v7  ;;  %980 = vadd.xlane.f32.xlu2 %v951_v9  ;;  %920 = vadd.xlane.f32.xlu0 %v2303_v10  ;;  %v953_v13 = vmul.f32 %v2303_v10, %v2303_v10 }
 0x17a   : > { %v1034_v15 = vmax.f32 %v1018_v12, 0.0  ;;  %984 = vadd.xlane.f32.xlu1 %v953_v13 }
 0x17b   : > { %v893_v16 = vpop.xlane.xlu0 %892 }
 0x17c   : > { %v1066_v17 = vadd.f32 1e-12, %v1034_v15  ;;  %v923_v20 = vmul.f32 0.0078125, %v893_v16 }
 0x17d   : > { %v957_v21 = vpop.xlane.xlu2 %956 }
 0x17e   : > { %1703 = vrsqrt.f32 %v1066_v17  ;;  %v1003_v22 = vmul.f32 %v923_v20, %v923_v20  ;;  %v987_v11 = vmul.f32 0.0078125, %v957_v21  ;;  %vm1088_vm1 = vweird.f32 %v1066_v17 }
 0x17f   : > { %v1051_v12 = vsub.f32 %v2207_v25, %v923_v20 }
 0x180   : > { %982 = vadd.xlane.f32.xlu0 %v952_v23  ;;  %v1019_v24 = vsub.f32 %v987_v11, %v1003_v22 }
 0x182   : > { %v1035_v26 = vmax.f32 %v1019_v24, 0.0 }
 0x183   : > { %v895_v27 = vpop.xlane.xlu1 %894 }
 0x184   : > { %v1704_v28 = vpop.eup %1703  ;;  %v2310_v29 = vmul.f32 0.0078125, %v895_v27  ;;  %v1067_v33 = vadd.f32 1e-12, %v1035_v26 }
 0x185   : > { %v1083_v30 = vmul.f32 %v1704_v28, %v1066_v17  ;;  %v959_v34 = vpop.xlane.xlu0 %958  ;;  %vm1089_vm0 = vweird.f32 %v1704_v28 }
 0x186   : > { %v1004_v35 = vmul.f32 %v2310_v29, %v2310_v29  ;;  %v988_v37 = vmul.f32 0.0078125, %v959_v34  ;;  %1705 = vrsqrt.f32 %v1067_v33  ;;  %vm1090_vm2 = vmor %vm1088_vm1, %vm1089_vm0  ;;  %vm1098_vm4 = vweird.f32 %v1067_v33 }
 0x187   : > { %v1084_v38 = vmul.f32 %v1704_v28, %v1083_v30 }
 0x188   : > { %v1020_v39 = vsub.f32 %v988_v37, %v1004_v35 }
 0x189   : > { %v1085_v40 = vmul.f32 0.5, %v1084_v38 }
 0x18a   : > { %v1036_v41 = vmax.f32 %v1020_v39, 0.0 }
 0x18b   : > { %v1086_v42 = vsub.f32 1.5, %v1085_v40  ;;  %v897_v44 = vpop.xlane.xlu1 %896 }
 0x18c   : > { %v1068_v45 = vadd.f32 1e-12, %v1036_v41  ;;  %v1706_v46 = vpop.eup %1705  ;;  %v2321_v60 = vmul.f32 0.0078125, %v897_v44 }
 0x18d   : > { %v1087_v48 = vmul.f32 %v1704_v28, %v1086_v42  ;;  %v1093_v52 = vmul.f32 %v1706_v46, %v1067_v33  ;;  %vm1099_vm3 = vweird.f32 %v1706_v46  ;;  %v1052_v33 = vsub.f32 %v2214_v36, %v2310_v29 }
 0x18e   : > { %1707 = vrsqrt.f32 %v1068_v45  ;;  %v1005_v6 = vmul.f32 %v2321_v60, %v2321_v60  ;;  %vm1100_vm5 = vmor %vm1098_vm4, %vm1099_vm3  ;;  %vm1108_vm7 = vweird.f32 %v1068_v45 }
 0x18f   : > { %v1091_v53 = vsel %vm1090_vm2, %v1704_v28, %v1087_v48  ;;  %v1094_v59 = vmul.f32 %v1706_v46, %v1093_v52 }
 0x190   : > { %v1242_v56 = vmul.f32 %v1091_v53, %v1050_v51 }
 0x191   : > { %v1095_v62 = vmul.f32 0.5, %v1094_v59 }
 0x192   : > { %v1259_v61 = vmul.f32 %v2315_v50, %v1242_v56 }
 0x193   : > { %v961_v63 = vpop.xlane.xlu1 %960  ;;  %v899_v0 = vpop.xlane.xlu2 %898  ;;  %v1096_v2 = vsub.f32 1.5, %v1095_v62 }
 0x194   : > { %v1708_v1 = vpop.eup %1707  ;;  %v1276_v14 = vadd.f32 %v2319_v54, %v1259_v61  ;;  %v989_v7 = vmul.f32 0.0078125, %v961_v63  ;;  %v2334_v17 = vmul.f32 0.0078125, %v899_v0 }
 0x195   : > { %v1103_v5 = vmul.f32 %v1708_v1, %v1068_v45  ;;  %v1097_v8 = vmul.f32 %v1706_v46, %v1096_v2  ;;  %vm1109_vm6 = vweird.f32 %v1708_v1 }
 0x196   : > { %1292 = vst [vmem:[%s2329_s21] sm:$0xff] %v1276_v14  ;;  %v1021_v9 = vsub.f32 %v989_v7, %v1005_v6  ;;  %v1006_v25 = vmul.f32 %v2334_v17, %v2334_v17  ;;  %vm1110_vm8 = vmor %vm1108_vm7, %vm1109_vm6  ;;  %v1053_v7 = vsub.f32 %v2221_v47, %v2321_v60 }
 0x197   : > { %v1104_v13 = vmul.f32 %v1708_v1, %v1103_v5  ;;  %v1101_v15 = vsel %vm1100_vm5, %v1706_v46, %v1097_v8 }
 0x198   : > { %v1037_v16 = vmax.f32 %v1021_v9, 0.0  ;;  %v1243_v21 = vmul.f32 %v1101_v15, %v1051_v12 }
 0x199   : > { %v1105_v22 = vmul.f32 0.5, %v1104_v13 }
 0x19a   : > { %v1069_v23 = vadd.f32 1e-12, %v1037_v16  ;;  %v1260_v11 = vmul.f32 %v2315_v50, %v1243_v21 }
 0x19b   : > { %v1106_v24 = vsub.f32 1.5, %v1105_v22  ;;  %v963_v26 = vpop.xlane.xlu2 %962 }
 0x19c   : > { %1709 = vrsqrt.f32 %v1069_v23  ;;  %v990_v20 = vmul.f32 0.0078125, %v963_v26  ;;  %v1277_v27 = vadd.f32 %v2319_v54, %v1260_v11  ;;  %vm1118_vm10 = vweird.f32 %v1069_v23 }
 0x19d   : > { %v1107_v28 = vmul.f32 %v1708_v1, %v1106_v24  ;;  %v965_v30 = vpop.xlane.xlu0 %964 }
 0x19e   : > { %v1022_v34 = vsub.f32 %v990_v20, %v1006_v25  ;;  %1293 = vst [vmem:[%s2329_s21 + $0x8] sm:$0xff] %v1277_v27  ;;  %v991_v51 = vmul.f32 0.0078125, %v965_v30 }
 0x19f   : > { %v1111_v35 = vsel %vm1110_vm8, %v1708_v1, %v1107_v28  ;;  %v1054_v28 = vsub.f32 %v2228_v58, %v2334_v17 }
 0x1a0   : > { %v1244_v37 = vmul.f32 %v1111_v35, %v1052_v33  ;;  %v1038_v38 = vmax.f32 %v1022_v34, 0.0 }
 0x1a2   : > { %v1710_v39 = vpop.eup %1709  ;;  %v1261_v40 = vmul.f32 %v2315_v50, %v1244_v37  ;;  %v1070_v41 = vadd.f32 1e-12, %v1038_v38 }
 0x1a3   : > { %v1113_v42 = vmul.f32 %v1710_v39, %v1069_v23  ;;  %v901_v44 = vpop.xlane.xlu2 %900  ;;  %vm1119_vm9 = vweird.f32 %v1710_v39 }
 0x1a4   : > { %v1278_v46 = vadd.f32 %v2319_v54, %v1261_v40  ;;  %1711 = vrsqrt.f32 %v1070_v41  ;;  %v2345_v45 = vmul.f32 0.0078125, %v901_v44  ;;  %vm1120_vm11 = vmor %vm1118_vm10, %vm1119_vm9  ;;  %vm1128_vm13 = vweird.f32 %v1070_v41 }
 0x1a5   : > { %v1114_v48 = vmul.f32 %v1710_v39, %v1113_v42  ;;  %v903_v36 = vpop.xlane.xlu0 %902  ;;  %v967_v29 = vpop.xlane.xlu1 %966 }
 0x1a6   : > { %1294 = vst [vmem:[%s2329_s21 + $0x10] sm:$0xff] %v1278_v46  ;;  %v1007_v52 = vmul.f32 %v2345_v45, %v2345_v45  ;;  %v2350_v53 = vmul.f32 0.0078125, %v903_v36  ;;  %v992_v62 = vmul.f32 0.0078125, %v967_v29 }
 0x1a7   : > { %v1115_v56 = vmul.f32 0.5, %v1114_v48 }
 0x1a8   : > { %v1023_v59 = vsub.f32 %v991_v51, %v1007_v52  ;;  %v1008_v61 = vmul.f32 %v2350_v53, %v2350_v53 }
 0x1a9   : > { %v1116_v63 = vsub.f32 1.5, %v1115_v56 }
 0x1aa   : > { %v1712_v0 = vpop.eup %1711  ;;  %v1039_v1 = vmax.f32 %v1023_v59, 0.0  ;;  %v1024_v14 = vsub.f32 %v992_v62, %v1008_v61 }
 0x1ab   : > { %v1117_v2 = vmul.f32 %v1710_v39, %v1116_v63  ;;  %v1123_v6 = vmul.f32 %v1712_v0, %v1070_v41  ;;  %vm1129_vm12 = vweird.f32 %v1712_v0 }
 0x1ac   : > { %v1071_v5 = vadd.f32 1e-12, %v1039_v1  ;;  %v1040_v8 = vmax.f32 %v1024_v14, 0.0  ;;  %vm1130_vm14 = vmor %vm1128_vm13, %vm1129_vm12  ;;  %v1055_v1 = vsub.f32 %v2233_v4, %v2345_v45 }
 0x1ad   : > { %v1121_v9 = vsel %vm1120_vm11, %v1710_v39, %v1117_v2  ;;  %v1124_v12 = vmul.f32 %v1712_v0, %v1123_v6  ;;  %v905_v13 = vpop.xlane.xlu1 %904  ;;  %v969_v15 = vpop.xlane.xlu2 %968 }
 0x1ae   : > { %v1245_v16 = vmul.f32 %v1121_v9, %v1053_v7  ;;  %1713 = vrsqrt.f32 %v1071_v5  ;;  %v1072_v21 = vadd.f32 1e-12, %v1040_v8  ;;  %v2356_v11 = vmul.f32 0.0078125, %v905_v13 }
 0x1af   : > { %v1125_v22 = vmul.f32 0.5, %v1124_v12  ;;  %v993_v60 = vmul.f32 0.0078125, %v969_v15  ;;  %vm1138_vm0 = vweird.f32 %v1071_v5  ;;  %v1056_v12 = vsub.f32 %v2241_v19, %v2350_v53 }
 0x1b0   : > { %v1262_v23 = vmul.f32 %v2315_v50, %v1245_v16  ;;  %1715 = vrsqrt.f32 %v1072_v21  ;;  %v1009_v47 = vmul.f32 %v2356_v11, %v2356_v11  ;;  %vm1148_vm3 = vweird.f32 %v1072_v21 }
 0x1b1   : > { %v1126_v24 = vsub.f32 1.5, %v1125_v22 }
 0x1b2   : > { %v1279_v26 = vadd.f32 %v2319_v54, %v1262_v23  ;;  %v1025_v20 = vsub.f32 %v993_v60, %v1009_v47 }
 0x1b3   : > { %v1127_v25 = vmul.f32 %v1712_v0, %v1126_v24 }
 0x1b4   : > { %v1714_v27 = vpop.eup %1713  ;;  %1295 = vst [vmem:[%s2329_s21 + $0x18] sm:$0xff] %v1279_v26  ;;  %v1041_v34 = vmax.f32 %v1025_v20, 0.0 }
 0x1b5   : > { %v1131_v30 = vsel %vm1130_vm14, %v1712_v0, %v1127_v25  ;;  %v1133_v33 = vmul.f32 %v1714_v27, %v1071_v5  ;;  %v907_v35 = vpop.xlane.xlu2 %906  ;;  %v971_v37 = vpop.xlane.xlu0 %970  ;;  %vm1139_vm15 = vweird.f32 %v1714_v27 }
 0x1b6   : > { %v1716_v38 = vpop.eup %1715  ;;  %v1246_v39 = vmul.f32 %v1131_v30, %v1054_v28  ;;  %v2365_v40 = vmul.f32 0.0078125, %v907_v35  ;;  %v1073_v41 = vadd.f32 1e-12, %v1041_v34  ;;  %v994_v58 = vmul.f32 0.0078125, %v971_v37  ;;  %vm1140_vm2 = vmor %vm1138_vm0, %vm1139_vm15 }
 0x1b7   : > { %v1134_v42 = vmul.f32 %v1714_v27, %v1133_v33  ;;  %v1143_v44 = vmul.f32 %v1716_v38, %v1072_v21  ;;  %vm1149_vm1 = vweird.f32 %v1716_v38  ;;  %v1057_v37 = vsub.f32 %v2249_v31, %v2356_v11 }
 0x1b8   : > { %v1263_v46 = vmul.f32 %v2315_v50, %v1246_v39  ;;  %v1010_v48 = vmul.f32 %v2365_v40, %v2365_v40  ;;  %1717 = vrsqrt.f32 %v1073_v41  ;;  %vm1150_vm4 = vmor %vm1148_vm3, %vm1149_vm1  ;;  %vm1158_vm6 = vweird.f32 %v1073_v41 }
 0x1b9   : > { %v1135_v17 = vmul.f32 0.5, %v1134_v42  ;;  %v1144_v36 = vmul.f32 %v1716_v38, %v1143_v44 }
 0x1ba   : > { %v1280_v29 = vadd.f32 %v2319_v54, %v1263_v46  ;;  %v1026_v51 = vsub.f32 %v994_v58, %v1010_v48 }
 0x1bb   : > { %v1136_v52 = vsub.f32 1.5, %v1135_v17  ;;  %v1145_v56 = vmul.f32 0.5, %v1144_v36 }
 0x1bc   : > { %1296 = vst [vmem:[%s2329_s21 + $0x20] sm:$0xff] %v1280_v29  ;;  %v1042_v59 = vmax.f32 %v1026_v51, 0.0 }
 0x1bd   : > { %v1137_v61 = vmul.f32 %v1714_v27, %v1136_v52  ;;  %v1146_v62 = vsub.f32 1.5, %v1145_v56  ;;  %v909_v63 = vpop.xlane.xlu0 %908  ;;  %v973_v0 = vpop.xlane.xlu1 %972  ;;  %v1058_v56 = vsub.f32 %v2256_v43, %v2365_v40 }
 0x1be   : > { %v1074_v14 = vadd.f32 1e-12, %v1042_v59  ;;  %v2374_v2 = vmul.f32 0.0078125, %v909_v63  ;;  %v1718_v6 = vpop.eup %1717  ;;  %v995_v45 = vmul.f32 0.0078125, %v973_v0 }
 0x1bf   : > { %v1141_v7 = vsel %vm1140_vm2, %v1714_v27, %v1137_v61  ;;  %v1147_v8 = vmul.f32 %v1716_v38, %v1146_v62  ;;  %v1153_v5 = vmul.f32 %v1718_v6, %v1073_v41  ;;  %vm1159_vm5 = vweird.f32 %v1718_v6 }
 0x1c0   : > { %v1247_v9 = vmul.f32 %v1141_v7, %v1055_v1  ;;  %1719 = vrsqrt.f32 %v1074_v14  ;;  %v1011_v4 = vmul.f32 %v2374_v2, %v2374_v2  ;;  %vm1160_vm7 = vmor %vm1158_vm6, %vm1159_vm5  ;;  %vm1168_vm9 = vweird.f32 %v1074_v14 }
 0x1c1   : > { %v1151_v13 = vsel %vm1150_vm4, %v1716_v38, %v1147_v8  ;;  %v1154_v22 = vmul.f32 %v1718_v6, %v1153_v5 }
 0x1c2   : > { %v1264_v15 = vmul.f32 %v2315_v50, %v1247_v9  ;;  %v1248_v16 = vmul.f32 %v1151_v13, %v1056_v12  ;;  %v1027_v23 = vsub.f32 %v995_v45, %v1011_v4 }
 0x1c3   : > { %v1155_v19 = vmul.f32 0.5, %v1154_v22 }
 0x1c4   : > { %v1281_v21 = vadd.f32 %v2319_v54, %v1264_v15  ;;  %v1265_v24 = vmul.f32 %v2315_v50, %v1248_v16  ;;  %v1043_v53 = vmax.f32 %v1027_v23, 0.0  ;;  %v1059_v23 = vsub.f32 %v2263_v55, %v2374_v2 }
 0x1c5   : > { %v911_v47 = vpop.xlane.xlu1 %910  ;;  %v975_v60 = vpop.xlane.xlu2 %974  ;;  %v1156_v20 = vsub.f32 1.5, %v1155_v19 }
 0x1c6   : > { %v1720_v26 = vpop.eup %1719  ;;  %1297 = vst [vmem:[%s2329_s21 + $0x28] sm:$0xff] %v1281_v21  ;;  %v1282_v25 = vadd.f32 %v2319_v54, %v1265_v24  ;;  %v2385_v27 = vmul.f32 0.0078125, %v911_v47  ;;  %v1075_v30 = vadd.f32 1e-12, %v1043_v53  ;;  %v996_v35 = vmul.f32 0.0078125, %v975_v60 }
 0x1c7   : > { %v1163_v28 = vmul.f32 %v1720_v26, %v1074_v14  ;;  %v1157_v33 = vmul.f32 %v1718_v6, %v1156_v20  ;;  %vm1169_vm8 = vweird.f32 %v1720_v26 }
 0x1c8   : > { %1298 = vst [vmem:[%s2329_s21 + $0x30] sm:$0xff] %v1282_v25  ;;  %v1012_v34 = vmul.f32 %v2385_v27, %v2385_v27  ;;  %1721 = vrsqrt.f32 %v1075_v30  ;;  %vm1170_vm10 = vmor %vm1168_vm9, %vm1169_vm8  ;;  %vm1178_vm12 = vweird.f32 %v1075_v30  ;;  %v1060_v55 = vsub.f32 %v2270_v3, %v2385_v27 }
 0x1c9   : > { %v1164_v38 = vmul.f32 %v1720_v26, %v1163_v28  ;;  %v1161_v39 = vsel %vm1160_vm7, %v1718_v6, %v1157_v33 }
 0x1ca   : > { %v1028_v42 = vsub.f32 %v996_v35, %v1012_v34  ;;  %v1249_v44 = vmul.f32 %v1161_v39, %v1057_v37 }
 0x1cb   : > { %v1165_v46 = vmul.f32 0.5, %v1164_v38 }
 0x1cc   : > { %v1044_v48 = vmax.f32 %v1028_v42, 0.0  ;;  %v1266_v58 = vmul.f32 %v2315_v50, %v1249_v44 }
 0x1cd   : > { %v1166_v17 = vsub.f32 1.5, %v1165_v46  ;;  %v913_v41 = vpop.xlane.xlu2 %912  ;;  %v977_v36 = vpop.xlane.xlu0 %976 }
 0x1ce   : > { %v1076_v29 = vadd.f32 1e-12, %v1044_v48  ;;  %v2393_v51 = vmul.f32 0.0078125, %v913_v41  ;;  %v1722_v52 = vpop.eup %1721  ;;  %v1283_v31 = vadd.f32 %v2319_v54, %v1266_v58  ;;  %v997_v63 = vmul.f32 0.0078125, %v977_v36 }
 0x1cf   : > { %v1167_v11 = vmul.f32 %v1720_v26, %v1166_v17  ;;  %v1173_v59 = vmul.f32 %v1722_v52, %v1075_v30  ;;  %vm1179_vm11 = vweird.f32 %v1722_v52 }
 0x1d0   : > { %1723 = vrsqrt.f32 %v1076_v29  ;;  %1299 = vst [vmem:[%s2329_s21 + $0x38] sm:$0xff] %v1283_v31  ;;  %v1013_v62 = vmul.f32 %v2393_v51, %v2393_v51  ;;  %vm1180_vm13 = vmor %vm1178_vm12, %vm1179_vm11  ;;  %vm1188_vm15 = vweird.f32 %v1076_v29  ;;  %v1061_v41 = vsub.f32 %v2277_v18, %v2393_v51 }
 0x1d1   : > { %v1171_v61 = vsel %vm1170_vm10, %v1720_v26, %v1167_v11  ;;  %v1174_v1 = vmul.f32 %v1722_v52, %v1173_v59 }
 0x1d2   : > { %v1250_v0 = vmul.f32 %v1171_v61, %v1058_v56  ;;  %v1029_v6 = vsub.f32 %v997_v63, %v1013_v62 }
 0x1d3   : > { %v1175_v8 = vmul.f32 0.5, %v1174_v1 }
 0x1d4   : > { %v1267_v7 = vmul.f32 %v2315_v50, %v1250_v0  ;;  %v1045_v14 = vmax.f32 %v1029_v6, 0.0 }
 0x1d5   : > { %v915_v9 = vpop.xlane.xlu0 %914  ;;  %v979_v12 = vpop.xlane.xlu1 %978  ;;  %v1176_v5 = vsub.f32 1.5, %v1175_v8 }
 0x1d6   : > { %v1724_v43 = vpop.eup %1723  ;;  %v1284_v40 = vadd.f32 %v2319_v54, %v1267_v7  ;;  %v2403_v13 = vmul.f32 0.0078125, %v915_v9  ;;  %v1077_v45 = vadd.f32 1e-12, %v1045_v14  ;;  %v998_v22 = vmul.f32 0.0078125, %v979_v12 }
 0x1d7   : > { %v1183_v4 = vmul.f32 %v1724_v43, %v1076_v29  ;;  %v1177_v15 = vmul.f32 %v1722_v52, %v1176_v5  ;;  %vm1189_vm14 = vweird.f32 %v1724_v43 }
 0x1d8   : > { %1300 = vst [vmem:[%s2329_s21 + $0x40] sm:$0xff] %v1284_v40  ;;  %v1014_v16 = vmul.f32 %v2403_v13, %v2403_v13  ;;  %1725 = vrsqrt.f32 %v1077_v45  ;;  %vm1190_vm0 = vmor %vm1188_vm15, %vm1189_vm14  ;;  %vm1198_vm2 = vweird.f32 %v1077_v45  ;;  %v1062_v14 = vsub.f32 %v2284_v32, %v2403_v13 }
 0x1d9   : > { %v1184_v21 = vmul.f32 %v1724_v43, %v1183_v4  ;;  %v1181_v24 = vsel %vm1180_vm13, %v1722_v52, %v1177_v15 }
 0x1da   : > { %v1030_v19 = vsub.f32 %v998_v22, %v1014_v16  ;;  %v1251_v53 = vmul.f32 %v1181_v24, %v1059_v23 }
 0x1db   : > { %v1185_v47 = vmul.f32 0.5, %v1184_v21 }
 0x1dc   : > { %v1046_v60 = vmax.f32 %v1030_v19, 0.0  ;;  %v1268_v26 = vmul.f32 %v2315_v50, %v1251_v53 }
 0x1dd   : > { %v1186_v25 = vsub.f32 1.5, %v1185_v47  ;;  %v917_v44 = vpop.xlane.xlu1 %916 }
 0x1de   : > { %v1078_v20 = vadd.f32 1e-12, %v1046_v60  ;;  %v1726_v28 = vpop.eup %1725  ;;  %v1285_v30 = vadd.f32 %v2319_v54, %v1268_v26  ;;  %v2418_v27 = vmul.f32 0.0078125, %v917_v44 }
 0x1df   : > { %v1187_v33 = vmul.f32 %v1724_v43, %v1186_v25  ;;  %v1193_v2 = vmul.f32 %v1726_v28, %v1077_v45  ;;  %vm1199_vm1 = vweird.f32 %v1726_v28 }
 0x1e0   : > { %1727 = vrsqrt.f32 %v1078_v20  ;;  %1301 = vst [vmem:[%s2329_s21 + $0x48] sm:$0xff] %v1285_v30  ;;  %vm1200_vm3 = vmor %vm1198_vm2, %vm1199_vm1  ;;  %v1015_v59 = vmul.f32 %v2418_v27, %v2418_v27  ;;  %vm1208_vm5 = vweird.f32 %v1078_v20 }
 0x1e1   : > { %v1191_v34 = vsel %vm1190_vm0, %v1724_v43, %v1187_v33  ;;  %v1194_v37 = vmul.f32 %v1726_v28, %v1193_v2 }
 0x1e2   : > { %v1252_v35 = vmul.f32 %v1191_v34, %v1060_v55 }
 0x1e3   : > { %v919_v38 = vpop.xlane.xlu2 %918  ;;  %v1195_v42 = vmul.f32 0.5, %v1194_v37 }
 0x1e4   : > { %v1269_v39 = vmul.f32 %v2315_v50, %v1252_v35  ;;  %v936_v40 = vmul.f32 0.0078125, %v919_v38  ;;  %v1063_v35 = vsub.f32 %v2291_v49, %v2418_v27 }
 0x1e5   : > { %v1196_v58 = vsub.f32 1.5, %v1195_v42 }
 0x1e6   : > { %v1728_v46 = vpop.eup %1727  ;;  %v1286_v48 = vadd.f32 %v2319_v54, %v1269_v39  ;;  %v1016_v23 = vmul.f32 %v936_v40, %v936_v40 }
 0x1e7   : > { %v1203_v17 = vmul.f32 %v1728_v46, %v1078_v20  ;;  %v1197_v3 = vmul.f32 %v1726_v28, %v1196_v58  ;;  %vm1209_vm4 = vweird.f32 %v1728_v46 }
 0x1e8   : > { %1302 = vst [vmem:[%s2329_s21 + $0x50] sm:$0xff] %v1286_v48  ;;  %vm1210_vm6 = vmor %vm1208_vm5, %vm1209_vm4 }
 0x1e9   : > { %v1204_v36 = vmul.f32 %v1728_v46, %v1203_v17  ;;  %v1201_v29 = vsel %vm1200_vm3, %v1726_v28, %v1197_v3 }
 0x1ea   : > { %v1253_v52 = vmul.f32 %v1201_v29, %v1061_v41  ;;  %v1064_v29 = vsub.f32 %v2296_v57, %v936_v40 }
 0x1eb   : > { %v1205_v31 = vmul.f32 0.5, %v1204_v36  ;;  %v981_v11 = vpop.xlane.xlu2 %980  ;;  %v921_v56 = vpop.xlane.xlu0 %920 }
 0x1ec   : > { %v999_v61 = vmul.f32 0.0078125, %v981_v11  ;;  %v937_v62 = vmul.f32 0.0078125, %v921_v56  ;;  %v1270_v63 = vmul.f32 %v2315_v50, %v1253_v52 }
 0x1ed   : > { %v1206_v0 = vsub.f32 1.5, %v1205_v31  ;;  %v985_v1 = vpop.xlane.xlu1 %984 }
 0x1ee   : > { %v1031_v6 = vsub.f32 %v999_v61, %v1015_v59  ;;  %v1017_v18 = vmul.f32 %v937_v62, %v937_v62  ;;  %v1001_v51 = vmul.f32 0.0078125, %v985_v1  ;;  %v1287_v7 = vadd.f32 %v2319_v54, %v1270_v63 }
 0x1ef   : > { %v1207_v8 = vmul.f32 %v1728_v46, %v1206_v0  ;;  %v1065_v44 = vsub.f32 %v2303_v10, %v937_v62 }
 0x1f0   : > { %v1047_v9 = vmax.f32 %v1031_v6, 0.0  ;;  %v1033_v12 = vsub.f32 %v1001_v51, %v1017_v18  ;;  %1303 = vst [vmem:[%s2329_s21 + $0x58] sm:$0xff] %v1287_v7 }
 0x1f1   : > { %v1211_v43 = vsel %vm1210_vm6, %v1728_v46, %v1207_v8 }
 0x1f2   : > { %v1254_v5 = vmul.f32 %v1211_v43, %v1062_v14  ;;  %v1079_v4 = vadd.f32 1e-12, %v1047_v9  ;;  %v1049_v45 = vmax.f32 %v1033_v12, 0.0 }
 0x1f3   : > { %v983_v15 = vpop.xlane.xlu0 %982 }
 0x1f4   : > { %v1271_v16 = vmul.f32 %v2315_v50, %v1254_v5  ;;  %1729 = vrsqrt.f32 %v1079_v4  ;;  %v1081_v22 = vadd.f32 1e-12, %v1049_v45  ;;  %v1000_v21 = vmul.f32 0.0078125, %v983_v15 }
 0x1f5   : > { %vm1218_vm8 = vweird.f32 %v1079_v4 }
 0x1f6   : > { %v1288_v24 = vadd.f32 %v2319_v54, %v1271_v16  ;;  %1731 = vrsqrt.f32 %v1081_v22  ;;  %v1032_v32 = vsub.f32 %v1000_v21, %v1016_v23  ;;  %vm1238_vm11 = vweird.f32 %v1081_v22 }
 0x1f8   : > { %1304 = vst [vmem:[%s2329_s21 + $0x60] sm:$0xff] %v1288_v24  ;;  %v1048_v13 = vmax.f32 %v1032_v32, 0.0 }
 0x1fa   : > { %v1730_v19 = vpop.eup %1729  ;;  %v1080_v47 = vadd.f32 1e-12, %v1048_v13 }
 0x1fb   : > { %v1213_v53 = vmul.f32 %v1730_v19, %v1079_v4  ;;  %vm1219_vm7 = vweird.f32 %v1730_v19 }
 0x1fc   : > { %v1732_v60 = vpop.eup %1731  ;;  %1733 = vrsqrt.f32 %v1080_v47  ;;  %vm1220_vm10 = vmor %vm1218_vm8, %vm1219_vm7  ;;  %vm1228_vm14 = vweird.f32 %v1080_v47 }
 0x1fd   : > { %v1214_v26 = vmul.f32 %v1730_v19, %v1213_v53  ;;  %v1233_v25 = vmul.f32 %v1732_v60, %v1081_v22  ;;  %vm1239_vm9 = vweird.f32 %v1732_v60 }
 0x1fe   : > { %vm1240_vm12 = vmor %vm1238_vm11, %vm1239_vm9 }
 0x1ff   : > { %v1215_v20 = vmul.f32 0.5, %v1214_v26  ;;  %v1234_v28 = vmul.f32 %v1732_v60, %v1233_v25 }
 0x201   : > { %v1216_v30 = vsub.f32 1.5, %v1215_v20  ;;  %v1235_v33 = vmul.f32 0.5, %v1234_v28 }
 0x202   : > { %v1734_v55 = vpop.eup %1733 }
 0x203   : > { %v1217_v2 = vmul.f32 %v1730_v19, %v1216_v30  ;;  %v1236_v34 = vsub.f32 1.5, %v1235_v33  ;;  %v1223_v37 = vmul.f32 %v1734_v55, %v1080_v47  ;;  %vm1229_vm13 = vweird.f32 %v1734_v55 }
 0x204   : > { %vm1230_vm15 = vmor %vm1228_vm14, %vm1229_vm13 }
 0x205   : > { %v1221_v38 = vsel %vm1220_vm10, %v1730_v19, %v1217_v2  ;;  %v1237_v39 = vmul.f32 %v1732_v60, %v1236_v34  ;;  %v1224_v46 = vmul.f32 %v1734_v55, %v1223_v37 }
 0x206   : > { %v1255_v42 = vmul.f32 %v1221_v38, %v1063_v35 }
 0x207   : > { %v1241_v48 = vsel %vm1240_vm12, %v1732_v60, %v1237_v39  ;;  %v1225_v3 = vmul.f32 0.5, %v1224_v46 }
 0x208   : > { %v1272_v58 = vmul.f32 %v2315_v50, %v1255_v42  ;;  %v1257_v17 = vmul.f32 %v1241_v48, %v1065_v44 }
 0x209   : > { %v1226_v41 = vsub.f32 1.5, %v1225_v3 }
 0x20a   : > { %v1289_v49 = vadd.f32 %v2319_v54, %v1272_v58  ;;  %v1274_v27 = vmul.f32 %v2315_v50, %v1257_v17 }
 0x20b   : > { %v1227_v36 = vmul.f32 %v1734_v55, %v1226_v41 }
 0x20c   : > { %1305 = vst [vmem:[%s2329_s21 + $0x68] sm:$0xff] %v1289_v49  ;;  %v1291_v10 = vadd.f32 %v2319_v54, %v1274_v27 }
 0x20d   : > { %v1231_v52 = vsel %vm1230_vm15, %v1734_v55, %v1227_v36 }
 0x20e   : > { %1307 = vst [vmem:[%s2329_s21 + $0x78] sm:$0xff] %v1291_v10  ;;  %v1256_v31 = vmul.f32 %v1231_v52, %v1064_v29 }
 0x210   : > { %v1273_v11 = vmul.f32 %v2315_v50, %v1256_v31 }
 0x212   : > { %v1290_v56 = vadd.f32 %v2319_v54, %v1273_v11 }
 0x214   : > { %1306 = vst [vmem:[%s2329_s21 + $0x70] sm:$0xff] %v1290_v56 }
 0x215   : > { %1882 = shalt.err (!%p1879_p10)
}
 0x216   : > { %s1943_s29 = smov 128   ;;  %s1944_s25 = smov 8  }
 0x217   : > { %1635 = dma.vmem_to_hbm [thread:$0]  (%p2043_p7), %s1322_s19, 2048, %s1324_s24, %s1309_s9, %s1943_s29, %s1943_s29, %s1944_s25  }
 0x218 PF: > { %s1338_s13 = sand.u32 1, %s1921_s15   ;;  %p2505_p3 = scmp.ge.s32.totalorder %s1933_s18, 2 }
 0x219   : > { %s1339_s14 = scalar_lea.sflag [#allocation4], %s1338_s13 }
 0x21a   : > { %p1652_p9 = pnand %p2505_p3, %p2005_p6 }
 0x21c   : > { %p1653_p8 = pneg %p1652_p9 }
 0x21e   : > { %1916 = dma.done.wait (%p1653_p8), %s1339_s14, 2048  }
 0x21f   : > { %1918 = vsyncadd (%p1653_p8), %s1339_s14, 4294965248  ;;  %s2506_s18 = sld [smem:[#allocation16_spill]]  ;;  %s2509_s15 = smov %s1925_s16 }
 0x220   : > { %s2507_s1 = sld [smem:[#allocation15_spill]] }
 0x221   : > { %s2508_s17 = sld [smem:[#allocation17_spill]] }
 0x225   : > { %p18_p12 = scmp.ge.s32.totalorder %s2506_s18, 4  }
 0x226   : > { %s2510_s16 = smov %s2507_s1 }
 0x227   :  { %20 = sbr.rel (!%p18_p12) target bundleno = 9 (0x9), region = 100 }
 0x22c   :  { %1345 = vsyncpa [#allocation3], 1 }
 0x22d   :  { %1347 = vsyncpa [#allocation3 + $0x1], 1 }
 0x22e   :  { %1348 = vsyncpa [#allocation6], 1 }
 0x22f   :  { %1349 = vsyncpa [#allocation4], 1 }
 0x230   :  { %1351 = vsyncpa [#allocation4 + $0x1], 1 }

</bundles_post_ra>
